<compile_context>
chip_gen: v5e
topology: v5e:2x2
jax: 0.10.0
libtpu: 0.0.40
codegen_flags: <defaults>
</compile_context>

<pallas_src>
import functools

import jax
import jax.numpy as jnp
from jax import lax
from jax.experimental import pallas as pl
from jax.experimental.pallas import tpu as pltpu


def _vmem_limit_bytes():
    """Generation-aware VMEM budget (v7x: 64 MiB/TC, v5e/v6e: 128 MiB)."""
    try:
        cap = int(pltpu.get_tpu_info().vmem_capacity_bytes)
    except Exception:
        cap = 128 * 1024 * 1024
    return int(min(max(cap - 16 * 1024 * 1024, 32 * 1024 * 1024),
                   100 * 1024 * 1024))


def _gsconvns_kernel(x_ref, w1_ref, b1_ref, w2_ref, b2_ref, w3_ref,
                     ym_ref, xm_ref, o_ref, xp_ref, *, pad, img_w):
    # Per grid step (one image), channels-major with H*W flattened into lanes:
    #   x_ref : (c1, HW)  bf16     w1_ref: (c_, c1)   bf16 (BN scale folded)
    #   w2_ref: (c_, 25)  f32 (BN scale folded)       w3_ref: (c2, 2c_) bf16
    #   ym/xm : (5, HW)   f32      o_ref : (c2, HW)   bf16
    #   xp_ref: (c_, HW + 2*pad) f32 VMEM scratch (padded x1)
    c_ = w1_ref.shape[0]
    hw = x_ref.shape[1]

    def silu(v):
        # exp + approximate reciprocal -> EUP slots, no multi-op VPU divide.
        return v * pl.reciprocal(1.0 + jnp.exp(-v), approx=True)

    # ---- cv1: 1x1 conv as (c_, c1) @ (c1, HW) on the MXU, + bias, SiLU -------
    x1 = jnp.dot(w1_ref[...], x_ref[...], preferred_element_type=jnp.float32)
    x1 = silu(x1 + b1_ref[...])

    # ---- stage x1 into the padded VMEM scratch --------------------------------
    # Zeroing the two small pad regions every step keeps the kernel correct
    # under megacore grid splitting; it is only O(c_ * (2W+2)) work.
    xp_ref[:, 0:pad] = jnp.zeros((c_, pad), jnp.float32)
    xp_ref[:, pad + hw:pad + hw + pad] = jnp.zeros((c_, pad), jnp.float32)
    xp_ref[:, pad:pad + hw] = x1

    # ---- cv2: 5x5 depthwise conv on the lane-flattened spatial axis ----------
    # Each of the 25 taps is a statically shifted lane window (plain vector
    # load from the padded scratch) * separable edge-validity mask * per-channel
    # tap weight, accumulated in f32.
    w2 = w2_ref[...]                                     # (c_, 25), loaded once
    acc = jnp.zeros((c_, hw), jnp.float32)
    t = 0
    for oy in range(-2, 3):
        for ox in range(-2, 3):
            start = pad + oy * img_w + ox
            win = xp_ref[:, start:start + hw]            # shifted x1 window
            m = ym_ref[oy + 2:oy + 3, :] * xm_ref[ox + 2:ox + 3, :]   # (1, HW)
            acc = acc + (win * m) * w2[:, t:t + 1]
            t += 1
    x2b = silu(acc + b2_ref[...])

    # ---- shuf: 1x1 conv over the channel concat, then ReLU -------------------
    if c_ >= 128:
        # K = c_ already feeds the MXU: two accumulating dots, no concat copy.
        y = jnp.dot(w3_ref[:, :c_], x1.astype(jnp.bfloat16),
                    preferred_element_type=jnp.float32)
        y = y + jnp.dot(w3_ref[:, c_:], x2b.astype(jnp.bfloat16),
                        preferred_element_type=jnp.float32)
    else:
        x2 = jnp.concatenate([x1, x2b], axis=0).astype(jnp.bfloat16)
        y = jnp.dot(w3_ref[...], x2, preferred_element_type=jnp.float32)
    o_ref[...] = jnp.maximum(y, 0.0).astype(o_ref.dtype)


def gsconvns_forward(x_nchw, kernel_params):
    w1, b1, w2, b2, w3 = kernel_params
    B, c1, H, W = x_nchw.shape
    c_ = w1.shape[0]
    c2 = w3.shape[0]
    HW = H * W
    pad = 2 * W + 2                                      # exact largest tap shift

    # Separable per-tap edge-validity masks (5 row-validity + 5 col-validity
    # rows), hoisted out of the kernel.  Combined per tap in-kernel at (1, HW)
    # cost; together they zero image-border taps and row wrap-around.
    hh = jnp.arange(H, dtype=jnp.int32).reshape(H, 1)
    ww = jnp.arange(W, dtype=jnp.int32).reshape(1, W)
    ym_rows, xm_rows = [], []
    for d in range(-2, 3):
        yv = jnp.broadcast_to((hh + d >= 0) & (hh + d < H), (H, W))
        xv = jnp.broadcast_to((ww + d >= 0) & (ww + d < W), (H, W))
        ym_rows.append(yv.reshape(HW))
        xm_rows.append(xv.reshape(HW))
    ym = jnp.stack(ym_rows, axis=0).astype(jnp.float32)   # (5, HW)
    xm = jnp.stack(xm_rows, axis=0).astype(jnp.float32)   # (5, HW)

    # Free reshape (stays channels-major NCHW); bf16 activation I/O halves the
    # per-step HBM->VMEM DMA (matmul accumulation stays f32 in the kernel).
    x_flat = x_nchw.reshape(B, c1, HW).astype(jnp.bfloat16)

    kernel = functools.partial(_gsconvns_kernel, pad=int(pad), img_w=int(W))
    grid_spec = pltpu.PrefetchScalarGridSpec(
        num_scalar_prefetch=0,
        grid=(B,),                                       # one image per grid step
        in_specs=[
            pl.BlockSpec((None, c1, HW), lambda b: (b, 0, 0)),  # lane-dense tile
            pl.BlockSpec((c_, c1), lambda b: (0, 0)),
            pl.BlockSpec((c_, 1), lambda b: (0, 0)),
            pl.BlockSpec((c_, 25), lambda b: (0, 0)),
            pl.BlockSpec((c_, 1), lambda b: (0, 0)),
            pl.BlockSpec((c2, 2 * c_), lambda b: (0, 0)),
            pl.BlockSpec((5, HW), lambda b: (0, 0)),
            pl.BlockSpec((5, HW), lambda b: (0, 0)),
        ],
        out_specs=pl.BlockSpec((None, c2, HW), lambda b: (b, 0, 0)),
        scratch_shapes=[pltpu.VMEM((c_, HW + 2 * pad), jnp.float32)],
    )
    out = pl.pallas_call(
        kernel,
        out_shape=jax.ShapeDtypeStruct((B, c2, HW), jnp.bfloat16),
        grid_spec=grid_spec,
        compiler_params=pltpu.CompilerParams(
            dimension_semantics=("parallel",),           # megacore-shard batch
            vmem_limit_bytes=_vmem_limit_bytes(),        # generation-aware budget
        ),
    )(x_flat, w1, b1, w2, b2, w3, ym, xm)
    return out.reshape(B, c2, H, W)                      # free reshape to NCHW


def init_params(key, c1, c2):
    """Deterministic synthetic parameters (matches module __init__ shapes)."""
    c_ = c2 // 2
    ks = jax.random.split(key, 11)
    eps = 1e-5
    # cv1 = Conv(c1, c_, k=1, s=1): Conv2d(c1,c_,1,bias=False) + BN + SiLU
    w1 = 0.2 * jax.random.normal(ks[0], (c_, c1, 1, 1), jnp.float32)
    g1 = 1.0 + 0.1 * jax.random.normal(ks[1], (c_,), jnp.float32)
    be1 = 0.1 * jax.random.normal(ks[2], (c_,), jnp.float32)
    m1 = 0.1 * jax.random.normal(ks[3], (c_,), jnp.float32)
    v1 = 1.0 + 0.1 * jnp.abs(jax.random.normal(ks[4], (c_,), jnp.float32))
    # cv2 = Conv(c_, c_, k=5, s=1, g=c_): depthwise Conv2d + BN + SiLU
    w2 = 0.2 * jax.random.normal(ks[5], (c_, 1, 5, 5), jnp.float32)
    g2 = 1.0 + 0.1 * jax.random.normal(ks[6], (c_,), jnp.float32)
    be2 = 0.1 * jax.random.normal(ks[7], (c_,), jnp.float32)
    m2 = 0.1 * jax.random.normal(ks[8], (c_,), jnp.float32)
    v2 = 1.0 + 0.1 * jnp.abs(jax.random.normal(ks[9], (c_,), jnp.float32))
    # shuf = nn.Conv2d(c_*2, c2, 1, 1, 0, bias=False)
    w3 = 0.2 * jax.random.normal(ks[10], (c2, 2 * c_, 1, 1), jnp.float32)

    raw = dict(w1=w1, g1=g1, be1=be1, m1=m1, v1=v1,
               w2=w2, g2=g2, be2=be2, m2=m2, v2=v2, w3=w3, eps=eps)

    # Fold BN (eval mode) into per-channel scale/bias, then fold the scales
    # straight into the conv weights (only the bias adds remain in-kernel).
    # 1x1-conv weights pre-cast to bf16 (MXU operands, f32 accumulation);
    # depthwise taps & biases stay f32 (VPU path).
    s1 = g1 / jnp.sqrt(v1 + eps)
    b1 = be1 - m1 * s1
    s2 = g2 / jnp.sqrt(v2 + eps)
    b2 = be2 - m2 * s2
    kparams = (
        (s1[:, None] * w1.reshape(c_, c1)).astype(jnp.bfloat16),  # (c_, c1)
        b1.reshape(c_, 1),
        s2[:, None] * w2.reshape(c_, 25),                         # tap t = dy*5+dx
        b2.reshape(c_, 1),
        w3.reshape(c2, 2 * c_).astype(jnp.bfloat16),              # (c2, 2*c_)
    )
    return raw, kparams


def ref_forward(x, raw):
    """Pure-JAX f32 reference (NCHW, mirrors the PyTorch eval-mode forward)."""
    eps = raw['eps']

    def bn(y, g, be, m, v):
        r = lambda a: a.reshape(1, -1, 1, 1)
        return (y - r(m)) / jnp.sqrt(r(v) + eps) * r(g) + r(be)

    silu = lambda y: y * jax.nn.sigmoid(y)
    dn = ('NCHW', 'OIHW', 'NCHW')
    x1 = lax.conv_general_dilated(x, raw['w1'], (1, 1), 'VALID',
                                  dimension_numbers=dn)
    x1 = silu(bn(x1, raw['g1'], raw['be1'], raw['m1'], raw['v1']))
    c_ = x1.shape[1]
    x2b = lax.conv_general_dilated(x1, raw['w2'], (1, 1), ((2, 2), (2, 2)),
                                   dimension_numbers=dn,
                                   feature_group_count=c_)
    x2b = silu(bn(x2b, raw['g2'], raw['be2'], raw['m2'], raw['v2']))
    x2 = jnp.concatenate([x1, x2b], axis=1)
    y = lax.conv_general_dilated(x2, raw['w3'], (1, 1), 'VALID',
                                 dimension_numbers=dn)
    return jnp.maximum(y, 0.0)


if __name__ == "__main__":
    key = jax.random.PRNGKey(0)
    B, c1, c2, H, W = 2, 4, 8, 16, 16
    kx, kp = jax.random.split(key)
    x = jax.random.normal(kx, (B, c1, H, W), jnp.float32)
    raw, kparams = init_params(kp, c1, c2)

    out = gsconvns_forward(x, kparams)
    out = jax.block_until_ready(out)

    ref = ref_forward(x, raw)
    assert out.shape == (B, c2, H, W), out.shape
    out_f32 = out.astype(jnp.float32)
    max_err = float(jnp.max(jnp.abs(out_f32 - ref)))
    # bf16 MXU operands, bf16 activation I/O, bf16 output store and an
    # approximate-reciprocal sigmoid -> slightly loose tolerance vs pure f32.
    if not jnp.allclose(out_f32, ref, atol=4e-2, rtol=4e-2):
        raise AssertionError(f"kernel/reference mismatch, max abs err {max_err:e}")
    print("KERNEL_OK")
</pallas_src>

<mosaic_0001>
module attributes {stable_mosaic.version = 11 : i64} {
  func.func @_gsconvns_kernel(%arg0: i32, %arg1: memref<1x4x256xbf16, #tpu.memory_space<vmem>>, %arg2: memref<4x4xbf16, #tpu.memory_space<vmem>>, %arg3: memref<4x1xf32, #tpu.memory_space<vmem>>, %arg4: memref<4x25xf32, #tpu.memory_space<vmem>>, %arg5: memref<4x1xf32, #tpu.memory_space<vmem>>, %arg6: memref<8x8xbf16, #tpu.memory_space<vmem>>, %arg7: memref<5x256xf32, #tpu.memory_space<vmem>>, %arg8: memref<5x256xf32, #tpu.memory_space<vmem>>, %arg9: memref<1x8x256xbf16, #tpu.memory_space<vmem>>, %arg10: memref<4x324xf32, #tpu.memory_space<vmem>>) attributes {dimension_semantics = [#tpu.dimension_semantics<parallel>], iteration_bounds = array<i64: 2>, scalar_prefetch = 0 : i64, scratch_operands = 1 : i64, tpu.core_type = #tpu.core_type<tc>, window_params = [{transform_indices = @transform_0, window_bounds = array<i64: 1, 4, 256>}, {pipeline_mode = #tpu.pipeline_mode<synchronous>, transform_indices = @transform_1, window_bounds = array<i64: 4, 4>}, {pipeline_mode = #tpu.pipeline_mode<synchronous>, transform_indices = @transform_2, window_bounds = array<i64: 4, 1>}, {pipeline_mode = #tpu.pipeline_mode<synchronous>, transform_indices = @transform_3, window_bounds = array<i64: 4, 25>}, {pipeline_mode = #tpu.pipeline_mode<synchronous>, transform_indices = @transform_4, window_bounds = array<i64: 4, 1>}, {pipeline_mode = #tpu.pipeline_mode<synchronous>, transform_indices = @transform_5, window_bounds = array<i64: 8, 8>}, {pipeline_mode = #tpu.pipeline_mode<synchronous>, transform_indices = @transform_6, window_bounds = array<i64: 5, 256>}, {pipeline_mode = #tpu.pipeline_mode<synchronous>, transform_indices = @transform_7, window_bounds = array<i64: 5, 256>}, {transform_indices = @transform_8, window_bounds = array<i64: 1, 8, 256>}]} {
    %c0 = arith.constant 0 : index
    %c0_0 = arith.constant 0 : index
    %0 = vector.load %arg2[%c0, %c0_0] : memref<4x4xbf16, #tpu.memory_space<vmem>>, vector<4x4xbf16>
    %c0_1 = arith.constant 0 : index
    %c0_2 = arith.constant 0 : index
    %c0_3 = arith.constant 0 : index
    %1 = vector.load %arg1[%c0_1, %c0_2, %c0_3] : memref<1x4x256xbf16, #tpu.memory_space<vmem>>, vector<1x4x256xbf16>
    %2 = vector.shape_cast %1 : vector<1x4x256xbf16> to vector<4x256xbf16>
    %cst = arith.constant dense<0.000000e+00> : vector<4x256xf32>
    %3 = tpu.matmul %0, %2, %cst {dimension_numbers = #tpu.dot_dimension_numbers<[1], [0], [0], [1], [0, 0, 1, 1], [], []>} : vector<4x4xbf16>, vector<4x256xbf16>, vector<4x256xf32> -> vector<4x256xf32>
    %c0_4 = arith.constant 0 : index
    %c0_5 = arith.constant 0 : index
    %4 = vector.load %arg3[%c0_4, %c0_5] : memref<4x1xf32, #tpu.memory_space<vmem>>, vector<4x1xf32>
    %5 = vector.broadcast %4 : vector<4x1xf32> to vector<4x256xf32>
    %6 = arith.addf %3, %5 : vector<4x256xf32>
    %cst_6 = arith.constant 0.000000e+00 : f32
    %7 = vector.broadcast %cst_6 : f32 to vector<4x256xf32>
    %8 = arith.subf %7, %6 : vector<4x256xf32>
    %9 = math.exp %8 : vector<4x256xf32>
    %cst_7 = arith.constant 1.000000e+00 : f32
    %10 = vector.broadcast %cst_7 : f32 to vector<4x256xf32>
    %11 = arith.addf %10, %9 : vector<4x256xf32>
    %12 = tpu.reciprocal %11 {approx = true} : vector<4x256xf32> -> vector<4x256xf32>
    %13 = arith.mulf %6, %12 : vector<4x256xf32>
    %cst_8 = arith.constant 0.000000e+00 : f32
    %14 = vector.broadcast %cst_8 : f32 to vector<4x34xf32>
    %c0_9 = arith.constant 0 : index
    %c0_10 = arith.constant 0 : index
    %15 = vector.load %arg10[%c0_9, %c0_10] : memref<4x324xf32, #tpu.memory_space<vmem>>, vector<4x34xf32>
    tpu.vector_store %arg10[%c0_9, %c0_10], %14 {strides = array<i32>} : memref<4x324xf32, #tpu.memory_space<vmem>>, vector<4x34xf32>,
    %cst_11 = arith.constant 0.000000e+00 : f32
    %16 = vector.broadcast %cst_11 : f32 to vector<4x34xf32>
    %c0_12 = arith.constant 0 : index
    %c290 = arith.constant 290 : index
    %17 = vector.load %arg10[%c0_12, %c290] : memref<4x324xf32, #tpu.memory_space<vmem>>, vector<4x34xf32>
    tpu.vector_store %arg10[%c0_12, %c290], %16 {strides = array<i32>} : memref<4x324xf32, #tpu.memory_space<vmem>>, vector<4x34xf32>,
    %c0_13 = arith.constant 0 : index
    %c34 = arith.constant 34 : index
    %18 = vector.load %arg10[%c0_13, %c34] : memref<4x324xf32, #tpu.memory_space<vmem>>, vector<4x256xf32>
    tpu.vector_store %arg10[%c0_13, %c34], %13 {strides = array<i32>} : memref<4x324xf32, #tpu.memory_space<vmem>>, vector<4x256xf32>,
    %c0_14 = arith.constant 0 : index
    %c0_15 = arith.constant 0 : index
    %19 = vector.load %arg4[%c0_14, %c0_15] : memref<4x25xf32, #tpu.memory_space<vmem>>, vector<4x25xf32>
    %cst_16 = arith.constant 0.000000e+00 : f32
    %20 = vector.broadcast %cst_16 : f32 to vector<4x256xf32>
    %c0_17 = arith.constant 0 : index
    %c0_18 = arith.constant 0 : index
    %21 = vector.load %arg10[%c0_17, %c0_18] : memref<4x324xf32, #tpu.memory_space<vmem>>, vector<4x256xf32>
    %c0_19 = arith.constant 0 : index
    %c0_20 = arith.constant 0 : index
    %22 = vector.load %arg7[%c0_19, %c0_20] : memref<5x256xf32, #tpu.memory_space<vmem>>, vector<1x256xf32>
    %c0_21 = arith.constant 0 : index
    %c0_22 = arith.constant 0 : index
    %23 = vector.load %arg8[%c0_21, %c0_22] : memref<5x256xf32, #tpu.memory_space<vmem>>, vector<1x256xf32>
    %24 = arith.mulf %22, %23 : vector<1x256xf32>
    %25 = vector.broadcast %24 : vector<1x256xf32> to vector<4x256xf32>
    %26 = arith.mulf %21, %25 : vector<4x256xf32>
    %27 = vector.extract_strided_slice %19 {offsets = [0, 0], sizes = [4, 1], strides = [1, 1]} : vector<4x25xf32> to vector<4x1xf32>
    %28 = vector.broadcast %27 : vector<4x1xf32> to vector<4x256xf32>
    %29 = arith.mulf %26, %28 : vector<4x256xf32>
    %30 = arith.addf %20, %29 : vector<4x256xf32>
    %c0_23 = arith.constant 0 : index
    %c1 = arith.constant 1 : index
    %31 = vector.load %arg10[%c0_23, %c1] : memref<4x324xf32, #tpu.memory_space<vmem>>, vector<4x256xf32>
    %c0_24 = arith.constant 0 : index
    %c0_25 = arith.constant 0 : index
    %32 = vector.load %arg7[%c0_24, %c0_25] : memref<5x256xf32, #tpu.memory_space<vmem>>, vector<1x256xf32>
    %c1_26 = arith.constant 1 : index
    %c0_27 = arith.constant 0 : index
    %33 = vector.load %arg8[%c1_26, %c0_27] : memref<5x256xf32, #tpu.memory_space<vmem>>, vector<1x256xf32>
    %34 = arith.mulf %32, %33 : vector<1x256xf32>
    %35 = vector.broadcast %34 : vector<1x256xf32> to vector<4x256xf32>
    %36 = arith.mulf %31, %35 : vector<4x256xf32>
    %37 = vector.extract_strided_slice %19 {offsets = [0, 1], sizes = [4, 1], strides = [1, 1]} : vector<4x25xf32> to vector<4x1xf32>
    %38 = vector.broadcast %37 : vector<4x1xf32> to vector<4x256xf32>
    %39 = arith.mulf %36, %38 : vector<4x256xf32>
    %40 = arith.addf %30, %39 : vector<4x256xf32>
    %c0_28 = arith.constant 0 : index
    %c2 = arith.constant 2 : index
    %41 = vector.load %arg10[%c0_28, %c2] : memref<4x324xf32, #tpu.memory_space<vmem>>, vector<4x256xf32>
    %c0_29 = arith.constant 0 : index
    %c0_30 = arith.constant 0 : index
    %42 = vector.load %arg7[%c0_29, %c0_30] : memref<5x256xf32, #tpu.memory_space<vmem>>, vector<1x256xf32>
    %c2_31 = arith.constant 2 : index
    %c0_32 = arith.constant 0 : index
    %43 = vector.load %arg8[%c2_31, %c0_32] : memref<5x256xf32, #tpu.memory_space<vmem>>, vector<1x256xf32>
    %44 = arith.mulf %42, %43 : vector<1x256xf32>
    %45 = vector.broadcast %44 : vector<1x256xf32> to vector<4x256xf32>
    %46 = arith.mulf %41, %45 : vector<4x256xf32>
    %47 = vector.extract_strided_slice %19 {offsets = [0, 2], sizes = [4, 1], strides = [1, 1]} : vector<4x25xf32> to vector<4x1xf32>
    %48 = vector.broadcast %47 : vector<4x1xf32> to vector<4x256xf32>
    %49 = arith.mulf %46, %48 : vector<4x256xf32>
    %50 = arith.addf %40, %49 : vector<4x256xf32>
    %c0_33 = arith.constant 0 : index
    %c3 = arith.constant 3 : index
    %51 = vector.load %arg10[%c0_33, %c3] : memref<4x324xf32, #tpu.memory_space<vmem>>, vector<4x256xf32>
    %c0_34 = arith.constant 0 : index
    %c0_35 = arith.constant 0 : index
    %52 = vector.load %arg7[%c0_34, %c0_35] : memref<5x256xf32, #tpu.memory_space<vmem>>, vector<1x256xf32>
    %c3_36 = arith.constant 3 : index
    %c0_37 = arith.constant 0 : index
    %53 = vector.load %arg8[%c3_36, %c0_37] : memref<5x256xf32, #tpu.memory_space<vmem>>, vector<1x256xf32>
    %54 = arith.mulf %52, %53 : vector<1x256xf32>
    %55 = vector.broadcast %54 : vector<1x256xf32> to vector<4x256xf32>
    %56 = arith.mulf %51, %55 : vector<4x256xf32>
    %57 = vector.extract_strided_slice %19 {offsets = [0, 3], sizes = [4, 1], strides = [1, 1]} : vector<4x25xf32> to vector<4x1xf32>
    %58 = vector.broadcast %57 : vector<4x1xf32> to vector<4x256xf32>
    %59 = arith.mulf %56, %58 : vector<4x256xf32>
    %60 = arith.addf %50, %59 : vector<4x256xf32>
    %c0_38 = arith.constant 0 : index
    %c4 = arith.constant 4 : index
    %61 = vector.load %arg10[%c0_38, %c4] : memref<4x324xf32, #tpu.memory_space<vmem>>, vector<4x256xf32>
    %c0_39 = arith.constant 0 : index
    %c0_40 = arith.constant 0 : index
    %62 = vector.load %arg7[%c0_39, %c0_40] : memref<5x256xf32, #tpu.memory_space<vmem>>, vector<1x256xf32>
    %c4_41 = arith.constant 4 : index
    %c0_42 = arith.constant 0 : index
    %63 = vector.load %arg8[%c4_41, %c0_42] : memref<5x256xf32, #tpu.memory_space<vmem>>, vector<1x256xf32>
    %64 = arith.mulf %62, %63 : vector<1x256xf32>
    %65 = vector.broadcast %64 : vector<1x256xf32> to vector<4x256xf32>
    %66 = arith.mulf %61, %65 : vector<4x256xf32>
    %67 = vector.extract_strided_slice %19 {offsets = [0, 4], sizes = [4, 1], strides = [1, 1]} : vector<4x25xf32> to vector<4x1xf32>
    %68 = vector.broadcast %67 : vector<4x1xf32> to vector<4x256xf32>
    %69 = arith.mulf %66, %68 : vector<4x256xf32>
    %70 = arith.addf %60, %69 : vector<4x256xf32>
    %c0_43 = arith.constant 0 : index
    %c16 = arith.constant 16 : index
    %71 = vector.load %arg10[%c0_43, %c16] : memref<4x324xf32, #tpu.memory_space<vmem>>, vector<4x256xf32>
    %c1_44 = arith.constant 1 : index
    %c0_45 = arith.constant 0 : index
    %72 = vector.load %arg7[%c1_44, %c0_45] : memref<5x256xf32, #tpu.memory_space<vmem>>, vector<1x256xf32>
    %c0_46 = arith.constant 0 : index
    %c0_47 = arith.constant 0 : index
    %73 = vector.load %arg8[%c0_46, %c0_47] : memref<5x256xf32, #tpu.memory_space<vmem>>, vector<1x256xf32>
    %74 = arith.mulf %72, %73 : vector<1x256xf32>
    %75 = vector.broadcast %74 : vector<1x256xf32> to vector<4x256xf32>
    %76 = arith.mulf %71, %75 : vector<4x256xf32>
    %77 = vector.extract_strided_slice %19 {offsets = [0, 5], sizes = [4, 1], strides = [1, 1]} : vector<4x25xf32> to vector<4x1xf32>
    %78 = vector.broadcast %77 : vector<4x1xf32> to vector<4x256xf32>
    %79 = arith.mulf %76, %78 : vector<4x256xf32>
    %80 = arith.addf %70, %79 : vector<4x256xf32>
    %c0_48 = arith.constant 0 : index
    %c17 = arith.constant 17 : index
    %81 = vector.load %arg10[%c0_48, %c17] : memref<4x324xf32, #tpu.memory_space<vmem>>, vector<4x256xf32>
    %c1_49 = arith.constant 1 : index
    %c0_50 = arith.constant 0 : index
    %82 = vector.load %arg7[%c1_49, %c0_50] : memref<5x256xf32, #tpu.memory_space<vmem>>, vector<1x256xf32>
    %c1_51 = arith.constant 1 : index
    %c0_52 = arith.constant 0 : index
    %83 = vector.load %arg8[%c1_51, %c0_52] : memref<5x256xf32, #tpu.memory_space<vmem>>, vector<1x256xf32>
    %84 = arith.mulf %82, %83 : vector<1x256xf32>
    %85 = vector.broadcast %84 : vector<1x256xf32> to vector<4x256xf32>
    %86 = arith.mulf %81, %85 : vector<4x256xf32>
    %87 = vector.extract_strided_slice %19 {offsets = [0, 6], sizes = [4, 1], strides = [1, 1]} : vector<4x25xf32> to vector<4x1xf32>
    %88 = vector.broadcast %87 : vector<4x1xf32> to vector<4x256xf32>
    %89 = arith.mulf %86, %88 : vector<4x256xf32>
    %90 = arith.addf %80, %89 : vector<4x256xf32>
    %c0_53 = arith.constant 0 : index
    %c18 = arith.constant 18 : index
    %91 = vector.load %arg10[%c0_53, %c18] : memref<4x324xf32, #tpu.memory_space<vmem>>, vector<4x256xf32>
    %c1_54 = arith.constant 1 : index
    %c0_55 = arith.constant 0 : index
    %92 = vector.load %arg7[%c1_54, %c0_55] : memref<5x256xf32, #tpu.memory_space<vmem>>, vector<1x256xf32>
    %c2_56 = arith.constant 2 : index
    %c0_57 = arith.constant 0 : index
    %93 = vector.load %arg8[%c2_56, %c0_57] : memref<5x256xf32, #tpu.memory_space<vmem>>, vector<1x256xf32>
    %94 = arith.mulf %92, %93 : vector<1x256xf32>
    %95 = vector.broadcast %94 : vector<1x256xf32> to vector<4x256xf32>
    %96 = arith.mulf %91, %95 : vector<4x256xf32>
    %97 = vector.extract_strided_slice %19 {offsets = [0, 7], sizes = [4, 1], strides = [1, 1]} : vector<4x25xf32> to vector<4x1xf32>
    %98 = vector.broadcast %97 : vector<4x1xf32> to vector<4x256xf32>
    %99 = arith.mulf %96, %98 : vector<4x256xf32>
    %100 = arith.addf %90, %99 : vector<4x256xf32>
    %c0_58 = arith.constant 0 : index
    %c19 = arith.constant 19 : index
    %101 = vector.load %arg10[%c0_58, %c19] : memref<4x324xf32, #tpu.memory_space<vmem>>, vector<4x256xf32>
    %c1_59 = arith.constant 1 : index
    %c0_60 = arith.constant 0 : index
    %102 = vector.load %arg7[%c1_59, %c0_60] : memref<5x256xf32, #tpu.memory_space<vmem>>, vector<1x256xf32>
    %c3_61 = arith.constant 3 : index
    %c0_62 = arith.constant 0 : index
    %103 = vector.load %arg8[%c3_61, %c0_62] : memref<5x256xf32, #tpu.memory_space<vmem>>, vector<1x256xf32>
    %104 = arith.mulf %102, %103 : vector<1x256xf32>
    %105 = vector.broadcast %104 : vector<1x256xf32> to vector<4x256xf32>
    %106 = arith.mulf %101, %105 : vector<4x256xf32>
    %107 = vector.extract_strided_slice %19 {offsets = [0, 8], sizes = [4, 1], strides = [1, 1]} : vector<4x25xf32> to vector<4x1xf32>
    %108 = vector.broadcast %107 : vector<4x1xf32> to vector<4x256xf32>
    %109 = arith.mulf %106, %108 : vector<4x256xf32>
    %110 = arith.addf %100, %109 : vector<4x256xf32>
    %c0_63 = arith.constant 0 : index
    %c20 = arith.constant 20 : index
    %111 = vector.load %arg10[%c0_63, %c20] : memref<4x324xf32, #tpu.memory_space<vmem>>, vector<4x256xf32>
    %c1_64 = arith.constant 1 : index
    %c0_65 = arith.constant 0 : index
    %112 = vector.load %arg7[%c1_64, %c0_65] : memref<5x256xf32, #tpu.memory_space<vmem>>, vector<1x256xf32>
    %c4_66 = arith.constant 4 : index
    %c0_67 = arith.constant 0 : index
    %113 = vector.load %arg8[%c4_66, %c0_67] : memref<5x256xf32, #tpu.memory_space<vmem>>, vector<1x256xf32>
    %114 = arith.mulf %112, %113 : vector<1x256xf32>
    %115 = vector.broadcast %114 : vector<1x256xf32> to vector<4x256xf32>
    %116 = arith.mulf %111, %115 : vector<4x256xf32>
    %117 = vector.extract_strided_slice %19 {offsets = [0, 9], sizes = [4, 1], strides = [1, 1]} : vector<4x25xf32> to vector<4x1xf32>
    %118 = vector.broadcast %117 : vector<4x1xf32> to vector<4x256xf32>
    %119 = arith.mulf %116, %118 : vector<4x256xf32>
    %120 = arith.addf %110, %119 : vector<4x256xf32>
    %c0_68 = arith.constant 0 : index
    %c32 = arith.constant 32 : index
    %121 = vector.load %arg10[%c0_68, %c32] : memref<4x324xf32, #tpu.memory_space<vmem>>, vector<4x256xf32>
    %c2_69 = arith.constant 2 : index
    %c0_70 = arith.constant 0 : index
    %122 = vector.load %arg7[%c2_69, %c0_70] : memref<5x256xf32, #tpu.memory_space<vmem>>, vector<1x256xf32>
    %c0_71 = arith.constant 0 : index
    %c0_72 = arith.constant 0 : index
    %123 = vector.load %arg8[%c0_71, %c0_72] : memref<5x256xf32, #tpu.memory_space<vmem>>, vector<1x256xf32>
    %124 = arith.mulf %122, %123 : vector<1x256xf32>
    %125 = vector.broadcast %124 : vector<1x256xf32> to vector<4x256xf32>
    %126 = arith.mulf %121, %125 : vector<4x256xf32>
    %127 = vector.extract_strided_slice %19 {offsets = [0, 10], sizes = [4, 1], strides = [1, 1]} : vector<4x25xf32> to vector<4x1xf32>
    %128 = vector.broadcast %127 : vector<4x1xf32> to vector<4x256xf32>
    %129 = arith.mulf %126, %128 : vector<4x256xf32>
    %130 = arith.addf %120, %129 : vector<4x256xf32>
    %c0_73 = arith.constant 0 : index
    %c33 = arith.constant 33 : index
    %131 = vector.load %arg10[%c0_73, %c33] : memref<4x324xf32, #tpu.memory_space<vmem>>, vector<4x256xf32>
    %c2_74 = arith.constant 2 : index
    %c0_75 = arith.constant 0 : index
    %132 = vector.load %arg7[%c2_74, %c0_75] : memref<5x256xf32, #tpu.memory_space<vmem>>, vector<1x256xf32>
    %c1_76 = arith.constant 1 : index
    %c0_77 = arith.constant 0 : index
    %133 = vector.load %arg8[%c1_76, %c0_77] : memref<5x256xf32, #tpu.memory_space<vmem>>, vector<1x256xf32>
    %134 = arith.mulf %132, %133 : vector<1x256xf32>
    %135 = vector.broadcast %134 : vector<1x256xf32> to vector<4x256xf32>
    %136 = arith.mulf %131, %135 : vector<4x256xf32>
    %137 = vector.extract_strided_slice %19 {offsets = [0, 11], sizes = [4, 1], strides = [1, 1]} : vector<4x25xf32> to vector<4x1xf32>
    %138 = vector.broadcast %137 : vector<4x1xf32> to vector<4x256xf32>
    %139 = arith.mulf %136, %138 : vector<4x256xf32>
    %140 = arith.addf %130, %139 : vector<4x256xf32>
    %c0_78 = arith.constant 0 : index
    %c34_79 = arith.constant 34 : index
    %141 = vector.load %arg10[%c0_78, %c34_79] : memref<4x324xf32, #tpu.memory_space<vmem>>, vector<4x256xf32>
    %c2_80 = arith.constant 2 : index
    %c0_81 = arith.constant 0 : index
    %142 = vector.load %arg7[%c2_80, %c0_81] : memref<5x256xf32, #tpu.memory_space<vmem>>, vector<1x256xf32>
    %c2_82 = arith.constant 2 : index
    %c0_83 = arith.constant 0 : index
    %143 = vector.load %arg8[%c2_82, %c0_83] : memref<5x256xf32, #tpu.memory_space<vmem>>, vector<1x256xf32>
    %144 = arith.mulf %142, %143 : vector<1x256xf32>
    %145 = vector.broadcast %144 : vector<1x256xf32> to vector<4x256xf32>
    %146 = arith.mulf %141, %145 : vector<4x256xf32>
    %147 = vector.extract_strided_slice %19 {offsets = [0, 12], sizes = [4, 1], strides = [1, 1]} : vector<4x25xf32> to vector<4x1xf32>
    %148 = vector.broadcast %147 : vector<4x1xf32> to vector<4x256xf32>
    %149 = arith.mulf %146, %148 : vector<4x256xf32>
    %150 = arith.addf %140, %149 : vector<4x256xf32>
    %c0_84 = arith.constant 0 : index
    %c35 = arith.constant 35 : index
    %151 = vector.load %arg10[%c0_84, %c35] : memref<4x324xf32, #tpu.memory_space<vmem>>, vector<4x256xf32>
    %c2_85 = arith.constant 2 : index
    %c0_86 = arith.constant 0 : index
    %152 = vector.load %arg7[%c2_85, %c0_86] : memref<5x256xf32, #tpu.memory_space<vmem>>, vector<1x256xf32>
    %c3_87 = arith.constant 3 : index
    %c0_88 = arith.constant 0 : index
    %153 = vector.load %arg8[%c3_87, %c0_88] : memref<5x256xf32, #tpu.memory_space<vmem>>, vector<1x256xf32>
    %154 = arith.mulf %152, %153 : vector<1x256xf32>
    %155 = vector.broadcast %154 : vector<1x256xf32> to vector<4x256xf32>
    %156 = arith.mulf %151, %155 : vector<4x256xf32>
    %157 = vector.extract_strided_slice %19 {offsets = [0, 13], sizes = [4, 1], strides = [1, 1]} : vector<4x25xf32> to vector<4x1xf32>
    %158 = vector.broadcast %157 : vector<4x1xf32> to vector<4x256xf32>
    %159 = arith.mulf %156, %158 : vector<4x256xf32>
    %160 = arith.addf %150, %159 : vector<4x256xf32>
    %c0_89 = arith.constant 0 : index
    %c36 = arith.constant 36 : index
    %161 = vector.load %arg10[%c0_89, %c36] : memref<4x324xf32, #tpu.memory_space<vmem>>, vector<4x256xf32>
    %c2_90 = arith.constant 2 : index
    %c0_91 = arith.constant 0 : index
    %162 = vector.load %arg7[%c2_90, %c0_91] : memref<5x256xf32, #tpu.memory_space<vmem>>, vector<1x256xf32>
    %c4_92 = arith.constant 4 : index
    %c0_93 = arith.constant 0 : index
    %163 = vector.load %arg8[%c4_92, %c0_93] : memref<5x256xf32, #tpu.memory_space<vmem>>, vector<1x256xf32>
    %164 = arith.mulf %162, %163 : vector<1x256xf32>
    %165 = vector.broadcast %164 : vector<1x256xf32> to vector<4x256xf32>
    %166 = arith.mulf %161, %165 : vector<4x256xf32>
    %167 = vector.extract_strided_slice %19 {offsets = [0, 14], sizes = [4, 1], strides = [1, 1]} : vector<4x25xf32> to vector<4x1xf32>
    %168 = vector.broadcast %167 : vector<4x1xf32> to vector<4x256xf32>
    %169 = arith.mulf %166, %168 : vector<4x256xf32>
    %170 = arith.addf %160, %169 : vector<4x256xf32>
    %c0_94 = arith.constant 0 : index
    %c48 = arith.constant 48 : index
    %171 = vector.load %arg10[%c0_94, %c48] : memref<4x324xf32, #tpu.memory_space<vmem>>, vector<4x256xf32>
    %c3_95 = arith.constant 3 : index
    %c0_96 = arith.constant 0 : index
    %172 = vector.load %arg7[%c3_95, %c0_96] : memref<5x256xf32, #tpu.memory_space<vmem>>, vector<1x256xf32>
    %c0_97 = arith.constant 0 : index
    %c0_98 = arith.constant 0 : index
    %173 = vector.load %arg8[%c0_97, %c0_98] : memref<5x256xf32, #tpu.memory_space<vmem>>, vector<1x256xf32>
    %174 = arith.mulf %172, %173 : vector<1x256xf32>
    %175 = vector.broadcast %174 : vector<1x256xf32> to vector<4x256xf32>
    %176 = arith.mulf %171, %175 : vector<4x256xf32>
    %177 = vector.extract_strided_slice %19 {offsets = [0, 15], sizes = [4, 1], strides = [1, 1]} : vector<4x25xf32> to vector<4x1xf32>
    %178 = vector.broadcast %177 : vector<4x1xf32> to vector<4x256xf32>
    %179 = arith.mulf %176, %178 : vector<4x256xf32>
    %180 = arith.addf %170, %179 : vector<4x256xf32>
    %c0_99 = arith.constant 0 : index
    %c49 = arith.constant 49 : index
    %181 = vector.load %arg10[%c0_99, %c49] : memref<4x324xf32, #tpu.memory_space<vmem>>, vector<4x256xf32>
    %c3_100 = arith.constant 3 : index
    %c0_101 = arith.constant 0 : index
    %182 = vector.load %arg7[%c3_100, %c0_101] : memref<5x256xf32, #tpu.memory_space<vmem>>, vector<1x256xf32>
    %c1_102 = arith.constant 1 : index
    %c0_103 = arith.constant 0 : index
    %183 = vector.load %arg8[%c1_102, %c0_103] : memref<5x256xf32, #tpu.memory_space<vmem>>, vector<1x256xf32>
    %184 = arith.mulf %182, %183 : vector<1x256xf32>
    %185 = vector.broadcast %184 : vector<1x256xf32> to vector<4x256xf32>
    %186 = arith.mulf %181, %185 : vector<4x256xf32>
    %187 = vector.extract_strided_slice %19 {offsets = [0, 16], sizes = [4, 1], strides = [1, 1]} : vector<4x25xf32> to vector<4x1xf32>
    %188 = vector.broadcast %187 : vector<4x1xf32> to vector<4x256xf32>
    %189 = arith.mulf %186, %188 : vector<4x256xf32>
    %190 = arith.addf %180, %189 : vector<4x256xf32>
    %c0_104 = arith.constant 0 : index
    %c50 = arith.constant 50 : index
    %191 = vector.load %arg10[%c0_104, %c50] : memref<4x324xf32, #tpu.memory_space<vmem>>, vector<4x256xf32>
    %c3_105 = arith.constant 3 : index
    %c0_106 = arith.constant 0 : index
    %192 = vector.load %arg7[%c3_105, %c0_106] : memref<5x256xf32, #tpu.memory_space<vmem>>, vector<1x256xf32>
    %c2_107 = arith.constant 2 : index
    %c0_108 = arith.constant 0 : index
    %193 = vector.load %arg8[%c2_107, %c0_108] : memref<5x256xf32, #tpu.memory_space<vmem>>, vector<1x256xf32>
    %194 = arith.mulf %192, %193 : vector<1x256xf32>
    %195 = vector.broadcast %194 : vector<1x256xf32> to vector<4x256xf32>
    %196 = arith.mulf %191, %195 : vector<4x256xf32>
    %197 = vector.extract_strided_slice %19 {offsets = [0, 17], sizes = [4, 1], strides = [1, 1]} : vector<4x25xf32> to vector<4x1xf32>
    %198 = vector.broadcast %197 : vector<4x1xf32> to vector<4x256xf32>
    %199 = arith.mulf %196, %198 : vector<4x256xf32>
    %200 = arith.addf %190, %199 : vector<4x256xf32>
    %c0_109 = arith.constant 0 : index
    %c51 = arith.constant 51 : index
    %201 = vector.load %arg10[%c0_109, %c51] : memref<4x324xf32, #tpu.memory_space<vmem>>, vector<4x256xf32>
    %c3_110 = arith.constant 3 : index
    %c0_111 = arith.constant 0 : index
    %202 = vector.load %arg7[%c3_110, %c0_111] : memref<5x256xf32, #tpu.memory_space<vmem>>, vector<1x256xf32>
    %c3_112 = arith.constant 3 : index
    %c0_113 = arith.constant 0 : index
    %203 = vector.load %arg8[%c3_112, %c0_113] : memref<5x256xf32, #tpu.memory_space<vmem>>, vector<1x256xf32>
    %204 = arith.mulf %202, %203 : vector<1x256xf32>
    %205 = vector.broadcast %204 : vector<1x256xf32> to vector<4x256xf32>
    %206 = arith.mulf %201, %205 : vector<4x256xf32>
    %207 = vector.extract_strided_slice %19 {offsets = [0, 18], sizes = [4, 1], strides = [1, 1]} : vector<4x25xf32> to vector<4x1xf32>
    %208 = vector.broadcast %207 : vector<4x1xf32> to vector<4x256xf32>
    %209 = arith.mulf %206, %208 : vector<4x256xf32>
    %210 = arith.addf %200, %209 : vector<4x256xf32>
    %c0_114 = arith.constant 0 : index
    %c52 = arith.constant 52 : index
    %211 = vector.load %arg10[%c0_114, %c52] : memref<4x324xf32, #tpu.memory_space<vmem>>, vector<4x256xf32>
    %c3_115 = arith.constant 3 : index
    %c0_116 = arith.constant 0 : index
    %212 = vector.load %arg7[%c3_115, %c0_116] : memref<5x256xf32, #tpu.memory_space<vmem>>, vector<1x256xf32>
    %c4_117 = arith.constant 4 : index
    %c0_118 = arith.constant 0 : index
    %213 = vector.load %arg8[%c4_117, %c0_118] : memref<5x256xf32, #tpu.memory_space<vmem>>, vector<1x256xf32>
    %214 = arith.mulf %212, %213 : vector<1x256xf32>
    %215 = vector.broadcast %214 : vector<1x256xf32> to vector<4x256xf32>
    %216 = arith.mulf %211, %215 : vector<4x256xf32>
    %217 = vector.extract_strided_slice %19 {offsets = [0, 19], sizes = [4, 1], strides = [1, 1]} : vector<4x25xf32> to vector<4x1xf32>
    %218 = vector.broadcast %217 : vector<4x1xf32> to vector<4x256xf32>
    %219 = arith.mulf %216, %218 : vector<4x256xf32>
    %220 = arith.addf %210, %219 : vector<4x256xf32>
    %c0_119 = arith.constant 0 : index
    %c64 = arith.constant 64 : index
    %221 = vector.load %arg10[%c0_119, %c64] : memref<4x324xf32, #tpu.memory_space<vmem>>, vector<4x256xf32>
    %c4_120 = arith.constant 4 : index
    %c0_121 = arith.constant 0 : index
    %222 = vector.load %arg7[%c4_120, %c0_121] : memref<5x256xf32, #tpu.memory_space<vmem>>, vector<1x256xf32>
    %c0_122 = arith.constant 0 : index
    %c0_123 = arith.constant 0 : index
    %223 = vector.load %arg8[%c0_122, %c0_123] : memref<5x256xf32, #tpu.memory_space<vmem>>, vector<1x256xf32>
    %224 = arith.mulf %222, %223 : vector<1x256xf32>
    %225 = vector.broadcast %224 : vector<1x256xf32> to vector<4x256xf32>
    %226 = arith.mulf %221, %225 : vector<4x256xf32>
    %227 = vector.extract_strided_slice %19 {offsets = [0, 20], sizes = [4, 1], strides = [1, 1]} : vector<4x25xf32> to vector<4x1xf32>
    %228 = vector.broadcast %227 : vector<4x1xf32> to vector<4x256xf32>
    %229 = arith.mulf %226, %228 : vector<4x256xf32>
    %230 = arith.addf %220, %229 : vector<4x256xf32>
    %c0_124 = arith.constant 0 : index
    %c65 = arith.constant 65 : index
    %231 = vector.load %arg10[%c0_124, %c65] : memref<4x324xf32, #tpu.memory_space<vmem>>, vector<4x256xf32>
    %c4_125 = arith.constant 4 : index
    %c0_126 = arith.constant 0 : index
    %232 = vector.load %arg7[%c4_125, %c0_126] : memref<5x256xf32, #tpu.memory_space<vmem>>, vector<1x256xf32>
    %c1_127 = arith.constant 1 : index
    %c0_128 = arith.constant 0 : index
    %233 = vector.load %arg8[%c1_127, %c0_128] : memref<5x256xf32, #tpu.memory_space<vmem>>, vector<1x256xf32>
    %234 = arith.mulf %232, %233 : vector<1x256xf32>
    %235 = vector.broadcast %234 : vector<1x256xf32> to vector<4x256xf32>
    %236 = arith.mulf %231, %235 : vector<4x256xf32>
    %237 = vector.extract_strided_slice %19 {offsets = [0, 21], sizes = [4, 1], strides = [1, 1]} : vector<4x25xf32> to vector<4x1xf32>
    %238 = vector.broadcast %237 : vector<4x1xf32> to vector<4x256xf32>
    %239 = arith.mulf %236, %238 : vector<4x256xf32>
    %240 = arith.addf %230, %239 : vector<4x256xf32>
    %c0_129 = arith.constant 0 : index
    %c66 = arith.constant 66 : index
    %241 = vector.load %arg10[%c0_129, %c66] : memref<4x324xf32, #tpu.memory_space<vmem>>, vector<4x256xf32>
    %c4_130 = arith.constant 4 : index
    %c0_131 = arith.constant 0 : index
    %242 = vector.load %arg7[%c4_130, %c0_131] : memref<5x256xf32, #tpu.memory_space<vmem>>, vector<1x256xf32>
    %c2_132 = arith.constant 2 : index
    %c0_133 = arith.constant 0 : index
    %243 = vector.load %arg8[%c2_132, %c0_133] : memref<5x256xf32, #tpu.memory_space<vmem>>, vector<1x256xf32>
    %244 = arith.mulf %242, %243 : vector<1x256xf32>
    %245 = vector.broadcast %244 : vector<1x256xf32> to vector<4x256xf32>
    %246 = arith.mulf %241, %245 : vector<4x256xf32>
    %247 = vector.extract_strided_slice %19 {offsets = [0, 22], sizes = [4, 1], strides = [1, 1]} : vector<4x25xf32> to vector<4x1xf32>
    %248 = vector.broadcast %247 : vector<4x1xf32> to vector<4x256xf32>
    %249 = arith.mulf %246, %248 : vector<4x256xf32>
    %250 = arith.addf %240, %249 : vector<4x256xf32>
    %c0_134 = arith.constant 0 : index
    %c67 = arith.constant 67 : index
    %251 = vector.load %arg10[%c0_134, %c67] : memref<4x324xf32, #tpu.memory_space<vmem>>, vector<4x256xf32>
    %c4_135 = arith.constant 4 : index
    %c0_136 = arith.constant 0 : index
    %252 = vector.load %arg7[%c4_135, %c0_136] : memref<5x256xf32, #tpu.memory_space<vmem>>, vector<1x256xf32>
    %c3_137 = arith.constant 3 : index
    %c0_138 = arith.constant 0 : index
    %253 = vector.load %arg8[%c3_137, %c0_138] : memref<5x256xf32, #tpu.memory_space<vmem>>, vector<1x256xf32>
    %254 = arith.mulf %252, %253 : vector<1x256xf32>
    %255 = vector.broadcast %254 : vector<1x256xf32> to vector<4x256xf32>
    %256 = arith.mulf %251, %255 : vector<4x256xf32>
    %257 = vector.extract_strided_slice %19 {offsets = [0, 23], sizes = [4, 1], strides = [1, 1]} : vector<4x25xf32> to vector<4x1xf32>
    %258 = vector.broadcast %257 : vector<4x1xf32> to vector<4x256xf32>
    %259 = arith.mulf %256, %258 : vector<4x256xf32>
    %260 = arith.addf %250, %259 : vector<4x256xf32>
    %c0_139 = arith.constant 0 : index
    %c68 = arith.constant 68 : index
    %261 = vector.load %arg10[%c0_139, %c68] : memref<4x324xf32, #tpu.memory_space<vmem>>, vector<4x256xf32>
    %c4_140 = arith.constant 4 : index
    %c0_141 = arith.constant 0 : index
    %262 = vector.load %arg7[%c4_140, %c0_141] : memref<5x256xf32, #tpu.memory_space<vmem>>, vector<1x256xf32>
    %c4_142 = arith.constant 4 : index
    %c0_143 = arith.constant 0 : index
    %263 = vector.load %arg8[%c4_142, %c0_143] : memref<5x256xf32, #tpu.memory_space<vmem>>, vector<1x256xf32>
    %264 = arith.mulf %262, %263 : vector<1x256xf32>
    %265 = vector.broadcast %264 : vector<1x256xf32> to vector<4x256xf32>
    %266 = arith.mulf %261, %265 : vector<4x256xf32>
    %267 = vector.extract_strided_slice %19 {offsets = [0, 24], sizes = [4, 1], strides = [1, 1]} : vector<4x25xf32> to vector<4x1xf32>
    %268 = vector.broadcast %267 : vector<4x1xf32> to vector<4x256xf32>
    %269 = arith.mulf %266, %268 : vector<4x256xf32>
    %270 = arith.addf %260, %269 : vector<4x256xf32>
    %c0_144 = arith.constant 0 : index
    %c0_145 = arith.constant 0 : index
    %271 = vector.load %arg5[%c0_144, %c0_145] : memref<4x1xf32, #tpu.memory_space<vmem>>, vector<4x1xf32>
    %272 = vector.broadcast %271 : vector<4x1xf32> to vector<4x256xf32>
    %273 = arith.addf %270, %272 : vector<4x256xf32>
    %cst_146 = arith.constant 0.000000e+00 : f32
    %274 = vector.broadcast %cst_146 : f32 to vector<4x256xf32>
    %275 = arith.subf %274, %273 : vector<4x256xf32>
    %276 = math.exp %275 : vector<4x256xf32>
    %cst_147 = arith.constant 1.000000e+00 : f32
    %277 = vector.broadcast %cst_147 : f32 to vector<4x256xf32>
    %278 = arith.addf %277, %276 : vector<4x256xf32>
    %279 = tpu.reciprocal %278 {approx = true} : vector<4x256xf32> -> vector<4x256xf32>
    %280 = arith.mulf %273, %279 : vector<4x256xf32>
    %281 = tpu.concatenate %13, %280 in 0 : vector<4x256xf32>, vector<4x256xf32> -> vector<8x256xf32>
    %282 = arith.truncf %281 : vector<8x256xf32> to vector<8x256xbf16>
    %c0_148 = arith.constant 0 : index
    %c0_149 = arith.constant 0 : index
    %283 = vector.load %arg6[%c0_148, %c0_149] : memref<8x8xbf16, #tpu.memory_space<vmem>>, vector<8x8xbf16>
    %cst_150 = arith.constant dense<0.000000e+00> : vector<8x256xf32>
    %284 = tpu.matmul %283, %282, %cst_150 {dimension_numbers = #tpu.dot_dimension_numbers<[1], [0], [0], [1], [0, 0, 1, 1], [], []>} : vector<8x8xbf16>, vector<8x256xbf16>, vector<8x256xf32> -> vector<8x256xf32>
    %cst_151 = arith.constant 0.000000e+00 : f32
    %285 = vector.broadcast %cst_151 : f32 to vector<8x256xf32>
    %286 = arith.maximumf %284, %285 : vector<8x256xf32>
    %287 = arith.truncf %286 : vector<8x256xf32> to vector<8x256xbf16>
    %c0_152 = arith.constant 0 : index
    %c0_153 = arith.constant 0 : index
    %c0_154 = arith.constant 0 : index
    %288 = vector.load %arg9[%c0_152, %c0_153, %c0_154] : memref<1x8x256xbf16, #tpu.memory_space<vmem>>, vector<1x8x256xbf16>
    %289 = vector.shape_cast %288 : vector<1x8x256xbf16> to vector<8x256xbf16>
    %290 = vector.shape_cast %287 : vector<8x256xbf16> to vector<1x8x256xbf16>
    tpu.vector_store %arg9[%c0_152, %c0_153, %c0_154], %290 {strides = array<i32>} : memref<1x8x256xbf16, #tpu.memory_space<vmem>>, vector<1x8x256xbf16>,
    return
  }
  func.func @transform_0(%arg0: i32) -> (i32, i32, i32) {
    %c0_i32 = arith.constant 0 : i32
    %c0_i32_0 = arith.constant 0 : i32
    %c0_i32_1 = arith.constant 0 : i32
    return %arg0, %c0_i32, %c0_i32_0 : i32, i32, i32
  }
  func.func @transform_1(%arg0: i32) -> (i32, i32) {
    %c0_i32 = arith.constant 0 : i32
    %c0_i32_0 = arith.constant 0 : i32
    %c0_i32_1 = arith.constant 0 : i32
    return %c0_i32, %c0_i32_0 : i32, i32
  }
  func.func @transform_2(%arg0: i32) -> (i32, i32) {
    %c0_i32 = arith.constant 0 : i32
    %c0_i32_0 = arith.constant 0 : i32
    %c0_i32_1 = arith.constant 0 : i32
    return %c0_i32, %c0_i32_0 : i32, i32
  }
  func.func @transform_3(%arg0: i32) -> (i32, i32) {
    %c0_i32 = arith.constant 0 : i32
    %c0_i32_0 = arith.constant 0 : i32
    %c0_i32_1 = arith.constant 0 : i32
    return %c0_i32, %c0_i32_0 : i32, i32
  }
  func.func @transform_4(%arg0: i32) -> (i32, i32) {
    %c0_i32 = arith.constant 0 : i32
    %c0_i32_0 = arith.constant 0 : i32
    %c0_i32_1 = arith.constant 0 : i32
    return %c0_i32, %c0_i32_0 : i32, i32
  }
  func.func @transform_5(%arg0: i32) -> (i32, i32) {
    %c0_i32 = arith.constant 0 : i32
    %c0_i32_0 = arith.constant 0 : i32
    %c0_i32_1 = arith.constant 0 : i32
    return %c0_i32, %c0_i32_0 : i32, i32
  }
  func.func @transform_6(%arg0: i32) -> (i32, i32) {
    %c0_i32 = arith.constant 0 : i32
    %c0_i32_0 = arith.constant 0 : i32
    %c0_i32_1 = arith.constant 0 : i32
    return %c0_i32, %c0_i32_0 : i32, i32
  }
  func.func @transform_7(%arg0: i32) -> (i32, i32) {
    %c0_i32 = arith.constant 0 : i32
    %c0_i32_0 = arith.constant 0 : i32
    %c0_i32_1 = arith.constant 0 : i32
    return %c0_i32, %c0_i32_0 : i32, i32
  }
  func.func @transform_8(%arg0: i32) -> (i32, i32, i32) {
    %c0_i32 = arith.constant 0 : i32
    %c0_i32_0 = arith.constant 0 : i32
    %c0_i32_1 = arith.constant 0 : i32
    return %arg0, %c0_i32, %c0_i32_0 : i32, i32, i32
  }
}

</mosaic_0001>

<bundles_post_ra>
// kernel: tpu_custom_call.1
= control target key start
LH: loop header
LB: loop body
LE: loop exit
PB: predicated region body
PF: predicated region fallthrough
CT: control target
= control target key end

     0   :  { %s3082_s0 = inlined_call_operand.vmem [shape: bf16[2,4,256], index: 0, kind: input, shape index: {}]   ;;  %s3083_s1 = inlined_call_operand.hbm [shape: bf16[4,4], index: 1, kind: input, shape index: {}]   ;;  %s3084_s2 = inlined_call_operand.vmem [shape: f32[4,1], index: 2, kind: input, shape index: {}]   ;;  %s3085_s3 = inlined_call_operand.hbm [shape: f32[4,25], index: 3, kind: input, shape index: {}]   ;;  %s3086_s4 = inlined_call_operand.vmem [shape: f32[4,1], index: 4, kind: input, shape index: {}]   ;;  %s3087_s5 = inlined_call_operand.hbm [shape: bf16[8,8], index: 5, kind: input, shape index: {}]   ;;  %s3088_s6 = inlined_call_operand.hbm [shape: f32[5,256], index: 6, kind: input, shape index: {}]   ;;  %s3089_s7 = inlined_call_operand.hbm [shape: f32[5,256], index: 7, kind: input, shape index: {}]   ;;  %s3090_s8 = inlined_call_operand.hbm [shape: bf16[2,8,256], index: 8, kind: output, shape index: {}]  }
   0x1   :  { %3122 = sst [smem:[#allocation27_spill]] %s3083_s1 }
   0x2   :  { %3123 = sst [smem:[#allocation28_spill]] %s3085_s3 }
   0x3   :  { %3124 = sst [smem:[#allocation29_spill]] %s3088_s6 }
   0x4   :  { %13 = vsyncpa [#allocation4], 0 }
   0x5   :  { %14 = vsyncpa [#allocation7], 0 }
   0x6   :  { %15 = vsyncpa [#allocation10], 0 }
   0x7   :  { %16 = vsyncpa [#allocation5], 0 }
   0x8   :  { %18 = vsyncpa [#allocation5 + $0x1], 0  ;;  %s2184_s27 = smov 0   ;;  %s2186_s28 = smov 0  }
   0x9   :  { %s2188_s29 = smov 0   ;;  %s2190_s30 = smov 0  }
   0xa LB: > { %s2205_s9 = sadd.s32 4294967295, %s2058_s30   ;;  %s1603_s10 = sadd.s32 4294967294, %s2058_s30   ;;  %s2058_s30 = sphi %s2190_s30, %s3177_s30   ;;  %s2054_s29 = sphi %s2188_s29, %s3176_s29   ;;  %s2050_s28 = sphi %s2186_s28, %s3175_s28   ;;  %s2046_s27 = sphi %s2184_s27, %s3174_s27  }
   0xb   : > { %s2209_s11 = sadd.s32 1, %s2058_s30   ;;  %s204_s12 = sadd.s32 1, %s2054_s29 }
   0xc   : > { %s201_s13 = ssub.s32 %s2058_s30, %s2209_s11  ;;  %p214_p0 = scmp.ne.s32.totalorder %s2054_s29, %s2050_s28 }
   0xd   : > { %p202_p1 = scmp.eq.s32.totalorder %s201_s13, 0  ;;  %p215_p2 = scmp.eq.s32.totalorder %s2205_s9, 1 }
   0xe   : > { %p220_p3 = scmp.ne.s32.totalorder %s2050_s28, %s2046_s27  ;;  %p221_p4 = scmp.eq.s32.totalorder %s1603_s10, 1 }
   0xf   : > { %s2220_s14 = scalar_select %p202_p1, %s2054_s29, %s204_s12  }
  0x10   : > { %p2222_p5 = por %p215_p2, %p214_p0  ;;  %p2226_p6 = por %p221_p4, %p220_p3 }
  0x11   : > { %p1604_p7 = scmp.ge.s32.totalorder %s2058_s30, 1  ;;  %p228_p8 = scmp.lt.s32.totalorder %s2058_s30, 3 }
  0x12   : > { %p1673_p9 = scmp.eq.s32.totalorder %s2205_s9, 0  ;;  %s3128_s3 = sld [smem:[#allocation28_spill]] }
  0x13   : > { %p2233_p10 = pnand %p1604_p7, %p228_p8  ;;  %s2060_s21 = smov [#allocation6]  }
  0x14   : > { %s257_s22 = sshll.u32 %s2060_s21, 4  ;;  %s3129_s6 = sld [smem:[#allocation29_spill]]  ;;  %s258_s22 = int_to_ptr.vmem [resolvable:$true] %s257_s22 }
  0x15   : > { %p1653_p11 = pneg %p2233_p10  ;;  %s3131_s1 = sld [smem:[#allocation27_spill]] }
  0x16   : > { %s2061_s18 = smov [#allocation9]   ;;  %s270_s24 = sshll.u32 %s3087_s5, 4  ;;  %s271_s24 = int_to_ptr.hbm [resolvable:$true] %s270_s24 }
  0x17   : > { %p2247_p12 = pnand %p1673_p9, %p1653_p11  ;;  %s284_s19 = sshll.u32 %s2061_s18, 4  ;;  %s285_s19 = int_to_ptr.vmem [resolvable:$true] %s284_s19 }
  0x18   : > { %s255_s20 = sshll.u32 %s3128_s3, 4  ;;  %s2062_s3 = smov [#allocation3]   ;;  %s256_s20 = int_to_ptr.hbm [resolvable:$true] %s255_s20 }
  0x19   : > { %1659 = dma.hbm_to_vmem [thread:$0]  (!%p2247_p12), %s256_s20, 64, %s258_s22, [#allocation7]  }
  0x1a   : > { %s282_s25 = sshll.u32 %s3129_s6, 4  ;;  %s242_s6 = sshll.u32 %s2062_s3, 4  ;;  %s283_s25 = int_to_ptr.hbm [resolvable:$true] %s282_s25  ;;  %s243_s6 = int_to_ptr.vmem [resolvable:$true] %s242_s6 }
  0x1b   : > { %s240_s13 = sshll.u32 %s3131_s1, 4  ;;  %s2063_s10 = smov [#allocation8]   ;;  %s241_s13 = int_to_ptr.hbm [resolvable:$true] %s240_s13 }
  0x1c   : > { %1665 = dma.hbm_to_vmem [thread:$0]  (!%p2247_p12), %s283_s25, 256, %s285_s19, [#allocation10]  }
  0x1d   : > { %1656 = dma.hbm_to_vmem [thread:$0]  (!%p2247_p12), %s241_s13, 32, %s243_s6, [#allocation4]  }
  0x1e   : > { %s272_s12 = sshll.u32 %s2063_s10, 4  ;;  %s294_s20 = sshll.u32 %s3089_s7, 4  ;;  %s273_s12 = int_to_ptr.vmem [resolvable:$true] %s272_s12  ;;  %s295_s20 = int_to_ptr.hbm [resolvable:$true] %s294_s20 }
  0x1f   : > { %1662 = dma.hbm_to_vmem [thread:$0]  (!%p2247_p12), %s271_s24, 64, %s273_s12, [#allocation7]  }
  0x20   : > { %s2064_s22 = smov [#allocation11]   ;;  %317 = sbr.rel (%p2233_p10) target bundleno = 769 (0x301), region = 52 }
  0x21   : > { %s296_s25 = sshll.u32 %s2064_s22, 4  ;;  %s297_s25 = int_to_ptr.vmem [resolvable:$true] %s296_s25 }
  0x22   : > { %1668 = dma.hbm_to_vmem [thread:$0]  (!%p2247_p12), %s295_s20, 256, %s297_s25, [#allocation10]  }
  0x25   : > { %2029 = dma.done.wait (%p1673_p9), [#allocation4], 32  }
  0x26   : > { %2031 = vsyncadd (%p1673_p9), [#allocation4], 4294967264 }
  0x27   : > { %2033 = dma.done.wait (%p1673_p9), [#allocation7], 128  }
  0x28   : > { %2035 = vsyncadd (%p1673_p9), [#allocation7], 4294967168 }
  0x29   : > { %2037 = dma.done.wait (%p1673_p9), [#allocation10], 512  }
  0x2a   : > { %2039 = vsyncadd (%p1673_p9), [#allocation10], 4294966784  ;;  %p372_p13 = scmp.lt.s32.totalorder %s2205_s9, 1  ;;  %v2065_v0 = vmov 0   ;;  %v2066_v1 = vmov 1   ;;  %vm394_vm0 = vcmask 1041408  }
  0x2b   : > { %1795 = vset.pattern.permute.xlu0 %v2065_v0  ;;  %1796 = vset.pattern.permute.xlu1 %v2065_v0  ;;  %v380_v3 = vld [vmem:[%s3084_s2] sm:$0xf]  ;;  %v2294_v4 = vld [vmem:[#allocation6] sm:$0xf]  ;;  %vm444_vm1 = vcmask 1043456   ;;  %vm390_vm2 = vcmask 31744  }
  0x2c   : > { %s373_s1 = scalar_select %p372_p13, %s2205_s9, 1  ;;  %1797 = vset.pattern.permute.xlu2 %v2066_v1  ;;  %383 = vperm.xlu0 %1795, %v380_v3   ;;  %v2297_v5 = vld [vmem:[#allocation9] ss:$8 sm:$0x3]  ;;  %v378_v23 = vld [vmem:[#allocation3] sm:$0x3] }
  0x2d   : > { %472 = vperm.xlu1 %1796, %v2294_v4   ;;  %v2299_v6 = vld [vmem:[#allocation11 + $0x1] ss:$8 sm:$0x3]  ;;  %501 = vperm.xlu2 %1797, %v2294_v4   ;;  %v2304_v8 = vld [vmem:[#allocation11 + $0x2] ss:$8 sm:$0x3] }
  0x2e   : > { %s1629_s3 = sshll.u32 %s373_s1, 2  ;;  %v485_v7 = vmul.f32 %v2299_v6, %v2297_v5  ;;  %v525_v9 = vmul.f32 %v2304_v8, %v2297_v5  ;;  %v2308_v10 = vld [vmem:[#allocation11 + $0x3] ss:$8 sm:$0x3]  ;;  %s2067_s21 = smov 1   ;;  %v2068_v24 = vmov 2  }
  0x2f   : > { %s376_s26 = scalar_lea.vmem %s3082_s0, %s1629_s3  ;;  %v565_v13 = vmul.f32 %v2308_v10, %v2297_v5  ;;  %v2313_v21 = vld [vmem:[#allocation11 + $0x4] ss:$8 sm:$0x3]  ;;  %v2069_v28 = vmov 5   ;;  %v2070_v31 = vmov 3   ;;  %s2071_s23 = smov 2  }
  0x30   : > { %v379_v2 = vld [vmem:[%s376_s26] sm:$0xf]  ;;  %v487_v11 = vperm.slane %v485_v7, 0  ;;  %v488_v12 = vperm.slane %v485_v7, 1  ;;  %v528_v15 = vperm.slane %v525_v9, 1  ;;  %v527_v25 = vperm.slane %v525_v9, 0 }
  0x31   : > { %387 = vst [vmem:[#allocation1] ss:$4 sm:$0xff] %v379_v2  ;;  %v568_v22 = vperm.slane %v565_v13, 1  ;;  %v605_v27 = vmul.f32 %v2313_v21, %v2297_v5  ;;  %v567_v29 = vperm.slane %v565_v13, 0  ;;  %s2072_s24 = smov 3   ;;  %v2073_v40 = vmov 4  }
  0x32   : > { %v489_v14 = vrot.slane %v488_v12, 4  ;;  %v529_v26 = vrot.slane %v528_v15, 4  ;;  %v643_v35 = vld [vmem:[#allocation9 + $0x1] ss:$8 sm:$0x3]  ;;  %s2074_s10 = smov 17  }
  0x33   : > { %v569_v30 = vrot.slane %v568_v22, 4  ;;  %v608_v33 = vperm.slane %v605_v27, 1  ;;  %v2323_v36 = vld [vmem:[#allocation11] ss:$8 sm:$0x3]  ;;  %v682_v37 = vmul.f32 %v643_v35, %v2299_v6  ;;  %v607_v38 = vperm.slane %v605_v27, 0 }
  0x34   : > { %v490_v20 = vsel %vm444_vm1, %v487_v11, %v489_v14  ;;  %1799 = vset.pattern.permute.xlu0 %v2070_v31  ;;  %v530_v32 = vsel %vm444_vm1, %v527_v25, %v529_v26  ;;  %v644_v41 = vmul.f32 %v643_v35, %v2323_v36  ;;  %s2075_s12 = smov 4   ;;  %v758_v48 = vmul.f32 %v643_v35, %v2308_v10  ;;  %v835_v56 = vld [vmem:[#allocation9 + $0x2] ss:$8 sm:$0x3]  ;;  %s2077_s18 = smov 16  }
  0x35   : > { %491 = vrot.lane.b32.xlu1 %v490_v20, %s2067_s21  ;;  %1798 = vset.pattern.permute.xlu2 %v2068_v24  ;;  %v570_v34 = vsel %vm444_vm1, %v567_v29, %v569_v30  ;;  %v609_v39 = vrot.slane %v608_v33, 4  ;;  %v684_v42 = vperm.slane %v682_v37, 0  ;;  %v685_v43 = vperm.slane %v682_v37, 1  ;;  %s2079_s20 = smov 32   ;;  %s2080_s22 = smov 19  }
  0x36   : > { %541 = vperm.xlu2 %1798, %v2294_v4   ;;  %1801 = vset.pattern.permute.xlu1 %v2069_v28  ;;  %v647_v46 = vperm.slane %v644_v41, 1  ;;  %v2076_v49 = vmov 6   ;;  %v646_v50 = vperm.slane %v644_v41, 0  ;;  %v720_v52 = vmul.f32 %v643_v35, %v2304_v8  ;;  %s2082_s25 = smov 18   ;;  %s2084_s1 = smov 20  }
  0x37   : > { %581 = vperm.xlu0 %1799, %v2294_v4   ;;  %v686_v44 = vrot.slane %v685_v43, 4  ;;  %v610_v45 = vsel %vm444_vm1, %v607_v38, %v609_v39  ;;  %v761_v53 = vperm.slane %v758_v48, 1  ;;  %v836_v57 = vmul.f32 %v835_v56, %v2323_v36  ;;  %s2085_s3 = smov 36   ;;  %v2352_v39 = vld [vmem:[#allocation9 + $0x3] ss:$8 sm:$0x3] }
  0x38   : > { %v388_v16 = vld.sshfl [vmem:[#allocation1] sm:$0xff pattern:$0x73625140]  ;;  %v389_v17 = vld.sshfl [vmem:[#allocation1 + $0x8] sm:$0xff pattern:$0x73625140]  ;;  %v796_v60 = vmul.f32 %v643_v35, %v2313_v21  ;;  %v949_v30 = vmul.f32 %v835_v56, %v2308_v10 }
  0x39   : > { %v395_v18 = vsel %vm394_vm0, %v388_v16, 0  ;;  %v397_v19 = vsel %vm394_vm0, %v389_v17, 0  ;;  %v687_v47 = vsel %vm444_vm1, %v684_v42, %v686_v44  ;;  %v648_v51 = vrot.slane %v647_v46, 4  ;;  %s2088_s6 = smov 34   ;;  %s2090_s17 = smov 33  }
  0x3a   : > { %406 = vmatpush.bf16.msra.mxu0 %v395_v18  ;;  %419 = vmatpush.bf16.msra.mxu1 %v397_v19  ;;  %v723_v55 = vperm.slane %v720_v52, 1  ;;  %v760_v58 = vperm.slane %v758_v48, 0  ;;  %v762_v59 = vrot.slane %v761_v53, 4  ;;  %v722_v61 = vperm.slane %v720_v52, 0  ;;  %s2092_s26 = smov 51   ;;  %s2093_s13 = smov 35  }
  0x3b   : > { %v649_v54 = vsel %vm444_vm1, %v646_v50, %v648_v51  ;;  %v2078_v63 = vmov 7   ;;  %v838_v1 = vperm.slane %v836_v57, 0  ;;  %v839_v2 = vperm.slane %v836_v57, 1  ;;  %s2095_s19 = smov 49   ;;  %s2097_s21 = smov 50  }
  0x3c   : > { %v724_v62 = vrot.slane %v723_v55, 4  ;;  %v763_v7 = vsel %vm444_vm1, %v760_v58, %v762_v59  ;;  %v799_v9 = vperm.slane %v796_v60, 1  ;;  %v798_v13 = vperm.slane %v796_v60, 0 }
  0x3d   : > { %1620 = vmatmul.msk.bf16.vlgmr.msra.gmra.mxu0 %vm390_vm2, %v378_v23  ;;  %1621 = vmatmul.msk.bf16.vlgmr.msra.gmra.mxu1 %vm390_vm2, %v378_v23  ;;  %v840_v3 = vrot.slane %v839_v2, 4  ;;  %v2081_v15 = vmov 9   ;;  %v2083_v16 = vmov 10   ;;  %v987_v18 = vmul.f32 %v835_v56, %v2313_v21 }
  0x3e   : > { %531 = vrot.lane.b32.xlu1 %v530_v32, %s2071_s23  ;;  %571 = vrot.lane.b32.xlu2 %v570_v34, %s2072_s24  ;;  %v725_v11 = vsel %vm444_vm1, %v722_v61, %v724_v62  ;;  %v800_v14 = vrot.slane %v799_v9, 4  ;;  %v912_v19 = vmul.f32 %v835_v56, %v2304_v8  ;;  %v874_v23 = vmul.f32 %v835_v56, %v2299_v6  ;;  %s2099_s23 = smov 48   ;;  %s2100_s24 = smov 64  }
  0x3f   : > { %1800 = vset.pattern.permute.xlu2 %v2073_v40  ;;  %688 = vrot.lane.b32.xlu0 %v687_v47, %s2074_s10  ;;  %v841_v12 = vsel %vm444_vm1, %v838_v1, %v840_v3  ;;  %v989_v20 = vperm.slane %v987_v18, 0  ;;  %v990_v22 = vperm.slane %v987_v18, 1  ;;  %v2086_v31 = vmov 8   ;;  %s2101_s10 = smov 66  }
  0x40   : > { %1802 = vset.pattern.permute.xlu0 %v2076_v49  ;;  %v801_v17 = vsel %vm444_vm1, %v798_v13, %v800_v14  ;;  %v915_v25 = vperm.slane %v912_v19, 1  ;;  %v877_v27 = vperm.slane %v874_v23, 1  ;;  %v914_v28 = vperm.slane %v912_v19, 0 }
  0x41   : > { %v991_v24 = vrot.slane %v990_v22, 4  ;;  %v2087_v32 = vmov 14   ;;  %v876_v33 = vperm.slane %v874_v23, 0  ;;  %v952_v37 = vperm.slane %v949_v30, 1 }
  0x42   : > { %v916_v29 = vrot.slane %v915_v25, 4  ;;  %v878_v34 = vrot.slane %v877_v27, 4  ;;  %v1141_v40 = vmul.f32 %v2352_v39, %v2308_v10  ;;  %v951_v41 = vperm.slane %v949_v30, 0 }
  0x43   : > { %v992_v26 = vsel %vm444_vm1, %v989_v20, %v991_v24  ;;  %v953_v42 = vrot.slane %v952_v37, 4  ;;  %v2089_v43 = vmov 13   ;;  %v2091_v46 = vmov 11  }
  0x44   : > { %v917_v35 = vsel %vm444_vm1, %v914_v28, %v916_v29  ;;  %v879_v38 = vsel %vm444_vm1, %v876_v33, %v878_v34  ;;  %v1143_v44 = vperm.slane %v1141_v40, 0  ;;  %v1065_v50 = vmul.f32 %v2352_v39, %v2299_v6 }
  0x45   : > { %v954_v48 = vsel %vm444_vm1, %v951_v41, %v953_v42  ;;  %v2094_v55 = vmov 12   ;;  %v2096_v60 = vmov 17   ;;  %v1027_v62 = vmul.f32 %v2352_v39, %v2323_v36 }
  0x46   : > { %611 = vrot.lane.b32.xlu1 %v610_v45, %s2075_s12  ;;  %620 = vperm.xlu2 %1800, %v2294_v4   ;;  %v1144_v45 = vperm.slane %v1141_v40, 1  ;;  %v1068_v51 = vperm.slane %v1065_v50, 1  ;;  %v1067_v52 = vperm.slane %v1065_v50, 0  ;;  %v2098_v3 = vmov 18   ;;  %s2103_s12 = smov 65  }
  0x47   : > { %698 = vperm.xlu0 %1802, %v2294_v4   ;;  %v1030_v1 = vperm.slane %v1027_v62, 1  ;;  %v2102_v25 = vmov 15   ;;  %v2104_v30 = vmov 22   ;;  %v2106_v33 = vmov 21  }
  0x48   : > { %v1145_v47 = vrot.slane %v1144_v45, 4  ;;  %v1069_v53 = vrot.slane %v1068_v51, 4  ;;  %v1179_v34 = vmul.f32 %v2352_v39, %v2313_v21  ;;  %vm574_vm3 = vcmask 23552  }
  0x49   : > { %v1031_v9 = vrot.slane %v1030_v1, 4  ;;  %vm534_vm4 = vcmask 15360   ;;  %vm691_vm5 = vcmask 138240   ;;  %vm729_vm6 = vcmask 146432  }
  0x4a   : > { %v1146_v49 = vsel %vm444_vm1, %v1143_v44, %v1145_v47  ;;  %v1070_v56 = vsel %vm444_vm1, %v1067_v52, %v1069_v53  ;;  %v1182_v37 = vperm.slane %v1179_v34, 1  ;;  %v1181_v42 = vperm.slane %v1179_v34, 0 }
  0x4b   : > { %vm845_vm7 = vcmask 261120   ;;  %vm805_vm8 = vcmask 162816   ;;  %vm449_vm9 = vcmask 277504   ;;  %vm958_vm10 = vcmask 285696  }
  0x4c   : > { %v1183_v44 = vrot.slane %v1182_v37, 4  ;;  %vm1150_vm11 = vcmask 416768   ;;  %vm1036_vm12 = vcmask 392192   ;;  %vm1074_vm13 = vcmask 400384  }
  0x4d   : > { %vm437_vm14 = vcmask 273408   ;;  %vm439_vm15 = vcmask 552208   ;;  %vm1188_vm0 = vcmask 424960  }
  0x4e   : > { %660 = vperm.xlu1 %1801, %v2294_v4   ;;  %650 = vrot.lane.b32.xlu2 %v649_v54, %s2077_s18  ;;  %v1103_v54 = vmul.f32 %v2352_v39, %v2304_v8  ;;  %s2108_s18 = smov 52  }
  0x4f   : > { %1803 = vset.pattern.permute.xlu2 %v2078_v63  ;;  %842 = vrot.lane.b32.xlu0 %v841_v12, %s2079_s20  ;;  %v2371_v63 = vld [vmem:[#allocation9 + $0x4] ss:$8 sm:$0x3]  ;;  %s2110_s20 = smov 68  }
  0x50   : > { %1806 = vset.pattern.permute.xlu0 %v2083_v16  ;;  %v1106_v57 = vperm.slane %v1103_v54, 1  ;;  %v1105_v58 = vperm.slane %v1103_v54, 0  ;;  %v1219_v2 = vmul.f32 %v2371_v63, %v2323_v36  ;;  %v1256_v20 = vmul.f32 %v2371_v63, %v2299_v6 }
  0x52   : > { %v1107_v59 = vrot.slane %v1106_v57, 4  ;;  %v1221_v13 = vperm.slane %v1219_v2, 0 }
  0x54   : > { %v1108_v61 = vsel %vm444_vm1, %v1105_v58, %v1107_v59 }
  0x56   : > { %764 = vrot.lane.b32.xlu1 %v763_v7, %s2080_s22  ;;  %726 = vrot.lane.b32.xlu2 %v725_v11, %s2082_s25  ;;  %v1029_v7 = vperm.slane %v1027_v62, 0  ;;  %v1222_v11 = vperm.slane %v1219_v2, 1  ;;  %s2112_s22 = smov 67   ;;  %s2116_s25 = smov 125  }
  0x57   : > { %1805 = vset.pattern.permute.xlu1 %v2081_v15  ;;  %852 = vperm.xlu0 %1806, %v2294_v4   ;;  %v1294_v15 = vmul.f32 %v2371_v63, %v2304_v8  ;;  %v1259_v8 = vperm.slane %v1256_v20, 1 }
  0x58   : > { %v1032_v12 = vsel %vm444_vm1, %v1029_v7, %v1031_v9  ;;  %v1223_v14 = vrot.slane %v1222_v11, 4 }
  0x59   : > { %v1296_v18 = vperm.slane %v1294_v15, 0  ;;  %v1260_v27 = vrot.slane %v1259_v8, 4 }
  0x5a   : > { %v1224_v16 = vsel %vm444_vm1, %v1221_v13, %v1223_v14  ;;  %v1332_v13 = vmul.f32 %v2371_v63, %v2308_v10 }
  0x5c   : > { %v1334_v10 = vperm.slane %v1332_v13, 0 }
  0x5e   : > { %802 = vrot.lane.b32.xlu1 %v801_v17, %s2084_s1  ;;  %736 = vperm.xlu2 %1803, %v2294_v4   ;;  %v1297_v17 = vperm.slane %v1294_v15, 1  ;;  %s2117_s1 = smov 126  }
  0x5f   : > { %993 = vrot.lane.b32.xlu0 %v992_v26, %s2085_s3  ;;  %v1258_v26 = vperm.slane %v1256_v20, 0  ;;  %s2118_s3 = smov 127  }
  0x60   : > { %1810 = vset.pattern.permute.xlu0 %v2087_v32  ;;  %v1298_v19 = vrot.slane %v1297_v17, 4  ;;  %v2105_v32 = vmov 16  }
  0x61   : > { %v1261_v6 = vsel %vm444_vm1, %v1258_v26, %v1260_v27 }
  0x62   : > { %v1299_v24 = vsel %vm444_vm1, %v1296_v18, %v1298_v19 }
  0x66   : > { %812 = vperm.xlu1 %1805, %v2294_v4   ;;  %1804 = vset.pattern.permute.xlu2 %v2086_v31 }
  0x67   : > { %774 = vperm.xlu2 %1804, %v2294_v4   ;;  %1003 = vperm.xlu0 %1810, %v2294_v4  }
  0x6e   : > { %918 = vrot.lane.b32.xlu1 %v917_v35, %s2088_s6 }
  0x6f   : > { %1809 = vset.pattern.permute.xlu1 %v2089_v43  ;;  %880 = vrot.lane.b32.xlu2 %v879_v38, %s2090_s17  ;;  %v1370_v38 = vmul.f32 %v2371_v63, %v2313_v21  ;;  %s2120_s17 = smov 124  }
  0x70   : > { %1807 = vset.pattern.permute.xlu2 %v2091_v46  ;;  %1147 = vrot.lane.b32.xlu0 %v1146_v49, %s2092_s26  ;;  %v2107_v49 = vmov 19   ;;  %s2121_s26 = smov 112  }
  0x71   : > { %1814 = vset.pattern.permute.xlu0 %v2098_v3  ;;  %v1372_v45 = vperm.slane %v1370_v38, 0  ;;  %v1373_v46 = vperm.slane %v1370_v38, 1 }
  0x73   : > { %v1374_v50 = vrot.slane %v1373_v46, 4 }
  0x76   : > { %955 = vrot.lane.b32.xlu1 %v954_v48, %s2093_s13  ;;  %v1184_v48 = vsel %vm444_vm1, %v1181_v42, %v1183_v44  ;;  %v2113_v42 = vmov 23   ;;  %s2122_s13 = smov 108  }
  0x77   : > { %890 = vperm.xlu2 %1807, %v2294_v4  }
  0x78   : > { %1157 = vperm.xlu0 %1814, %v2294_v4  }
  0x7e   : > { %965 = vperm.xlu1 %1809, %v2294_v4  }
  0x7f   : > { %1808 = vset.pattern.permute.xlu2 %v2094_v55  ;;  %v1375_v55 = vsel %vm444_vm1, %v1372_v45, %v1374_v50 }
  0x80   : > { %927 = vperm.xlu2 %1808, %v2294_v4   ;;  %1300 = vrot.lane.b32.xlu0 %v1299_v24, %s2101_s10  ;;  %v2111_v24 = vmov 20   ;;  %s3117_s10 = smov 96  }
  0x81   : > { %1818 = vset.pattern.permute.xlu0 %v2104_v30 }
  0x86   : > { %1071 = vrot.lane.b32.xlu1 %v1070_v56, %s2095_s19  ;;  %s2123_s19 = smov 110  }
  0x87   : > { %1813 = vset.pattern.permute.xlu1 %v2096_v60  ;;  %v2384_v22 = vpop.permute.xlu2 %501 }
  0x88   : > { %1033 = vrot.lane.b32.xlu2 %v1032_v12, %s2099_s23  ;;  %1310 = vperm.xlu0 %1818, %v2294_v4   ;;  %s2125_s23 = smov 94  }
  0x89   : > { %1811 = vset.pattern.permute.xlu2 %v2102_v25 }
  0x8e   : > { %1109 = vrot.lane.b32.xlu1 %v1108_v61, %s2097_s21  ;;  %s2124_s21 = smov 109  }
  0x90   : > { %1043 = vperm.xlu2 %1811, %v2294_v4   ;;  %v2391_v28 = vpop.permute.xlu2 %541  ;;  %1821 = vset.pattern.permute.xlu0 %v2065_v0  ;;  %v2109_v0 = vmov 24  }
  0x96   : > { %1119 = vperm.xlu1 %1813, %v2294_v4  }
  0x98   : > { %1812 = vset.pattern.permute.xlu2 %v2105_v32  ;;  %v2400_v35 = vpop.permute.xlu2 %571 }
  0x99   : > { %1081 = vperm.xlu2 %1812, %v2294_v4   ;;  %v3103_v40 = vrot.slane %v2400_v35, 4 }
  0x9b   : > { %v2411_v39 = vsel %vm574_vm3, %v3103_v40, %v2400_v35  ;;  %vm1265_vm3 = vcmask 531456  }
  0x9e   : > { %1225 = vrot.lane.b32.xlu1 %v1224_v16, %s2100_s24  ;;  %v384_v31 = vpop.permute.xlu0 %383  ;;  %v1335_v16 = vperm.slane %v1332_v13, 1 }
  0x9f   : > { %v2386_v23 = vpop.permute.xlu1 %472  ;;  %1817 = vset.pattern.permute.xlu1 %v2106_v33 }
  0xa0   : > { %v2423_v56 = vpop.permute.xlu2 %620  ;;  %v1336_v63 = vrot.slane %v1335_v16, 4 }
  0xa1   : > { %1815 = vset.pattern.permute.xlu2 %v2107_v49 }
  0xa2   : > { %1185 = vrot.lane.b32.xlu2 %v1184_v48, %s2108_s18  ;;  %s3116_s18 = smov 80  }
  0xa6   : > { %1262 = vrot.lane.b32.xlu1 %v1261_v6, %s2103_s12  ;;  %v1337_v6 = vsel %vm444_vm1, %v1334_v10, %v1336_v63  ;;  %s2127_s12 = smov 95  }
  0xa7   : > { %v2393_v29 = vpop.permute.xlu1 %491 }
  0xa8   : > { %v2443_v12 = vpop.permute.xlu2 %650 }
  0xa9   : > { %v2413_v47 = vpop.permute.xlu0 %581 }
  0xaa   : > { %1195 = vperm.xlu2 %1815, %v2294_v4  }
  0xae   : > { %1272 = vperm.xlu1 %1817, %v2294_v4  }
  0xb0   : > { %v2405_v41 = vpop.permute.xlu1 %531  ;;  %v2453_v8 = vpop.permute.xlu2 %726 }
  0xb1   : > { %v3102_v43 = vrot.slane %v2405_v41, 4  ;;  %v2428_v1 = vpop.permute.xlu0 %688  ;;  %v3095_v25 = vrot.slane %v2453_v8, 4 }
  0xb2   : > { %v3100_v3 = vrot.slane %v2428_v1, 4  ;;  %1816 = vset.pattern.permute.xlu2 %v2111_v24 }
  0xb3   : > { %v2419_v21 = vsel %vm534_vm4, %v3102_v43, %v2405_v41  ;;  %1235 = vperm.xlu2 %1816, %v2294_v4   ;;  %v2461_v27 = vsel %vm729_vm6, %v3095_v25, %v2453_v8  ;;  %vm453_vm4 = vcmask 1043728  }
  0xb4   : > { %v2441_v11 = vsel %vm691_vm5, %v3100_v3, %v2428_v1  ;;  %vm454_vm5 = vcmask 1047556  }
  0xb5   : > { %vm455_vm6 = vmor %vm454_vm5, %vm453_vm4  ;;  %vm638_vm4 = vcmask 1014784   ;;  %vm678_vm5 = vcmask 916480  }
  0xb6   : > { %1820 = vset.pattern.permute.xlu1 %v2109_v0 }
  0xb7   : > { %1376 = vrot.lane.b32.xlu1 %v1375_v55, %s2110_s20  ;;  %s3115_s20 = smov 93  }
  0xb8   : > { %v2425_v59 = vpop.permute.xlu1 %611  ;;  %v2474_v38 = vpop.permute.xlu2 %736 }
  0xb9   : > { %v3098_v60 = vrot.slane %v2425_v59, 4  ;;  %v2450_v17 = vpop.permute.xlu0 %698 }
  0xba   : > { %v408_v51 = vpop.f32.mrf.mxu0  ;;  %v421_v52 = vpop.f32.mrf.mxu1 }
  0xbb   : > { %v409_v53 = vadd.f32 %v408_v51, %v384_v31  ;;  %v422_v54 = vadd.f32 %v421_v52, %v384_v31  ;;  %v2434_v2 = vsel %vm390_vm2, %v3098_v60, %v2425_v59  ;;  %1338 = vrot.lane.b32.xlu2 %v1337_v6, %s2112_s22  ;;  %vm1303_vm2 = vcmask 539648   ;;  %s2130_s22 = smov 92  }
  0xbc   : > { %1819 = vset.pattern.permute.xlu2 %v2113_v42 }
  0xbd   : > { %v425_v57 = vsub.f32 0.0, %v409_v53  ;;  %v426_v58 = vsub.f32 0.0, %v422_v54 }
  0xbf   : > { %v427_v61 = vmul.f32 1.442695, %v425_v57  ;;  %v429_v62 = vmul.f32 1.442695, %v426_v58  ;;  %1386 = vperm.xlu1 %1820, %v2294_v4  }
  0xc0   : > { %v2448_v14 = vpop.permute.xlu1 %660 }
  0xc1   : > { %1822 = vpow2.f32 %v427_v61  ;;  %v2464_v30 = vpop.permute.xlu0 %842  ;;  %v2493_v52 = vpop.permute.xlu2 %774 }
  0xc2   : > { %1824 = vpow2.f32 %v429_v62  ;;  %v410_v7 = vpop.f32.mrf.mxu0  ;;  %v423_v9 = vpop.f32.mrf.mxu1  ;;  %v3099_v32 = vrot.slane %v2464_v30, 4 }
  0xc3   : > { %1348 = vperm.xlu2 %1819, %v2294_v4  }
  0xc4   : > { %v2472_v37 = vsel %vm845_vm7, %v3099_v32, %v2464_v30  ;;  %vm494_vm7 = vcmask 7168  }
  0xc7   : > { %v1823_v15 = vpop.eup %1822 }
  0xc8   : > { %v1825_v18 = vpop.eup %1824  ;;  %v431_v19 = vadd.f32 1.0, %v1823_v15  ;;  %v2456_v26 = vpop.permute.xlu1 %764 }
  0xc9   : > { %v432_v20 = vadd.f32 1.0, %v1825_v18  ;;  %v2485_v50 = vpop.permute.xlu0 %852  ;;  %v2499_v55 = vpop.permute.xlu2 %880 }
  0xca   : > { %1826 = vrcp.f32 %v431_v19 }
  0xcb   : > { %1828 = vrcp.f32 %v432_v20 }
  0xd0   : > { %v1827_v31 = vpop.eup %1826  ;;  %v2479_v46 = vpop.permute.xlu1 %802 }
  0xd1   : > { %v1829_v33 = vpop.eup %1828  ;;  %v2476_v44 = vmul.f32 %v1827_v31, %v409_v53  ;;  %v3096_v49 = vrot.slane %v2479_v46, 4  ;;  %v2512_v61 = vpop.permute.xlu2 %890 }
  0xd2   : > { %v2467_v34 = vmul.f32 %v1829_v33, %v422_v54  ;;  %v2497_v54 = vpop.permute.xlu0 %993 }
  0xd3   : > { %3133 = vst [vmem:[#allocation18_spill] sm:$0xff] %v2476_v44  ;;  %v2490_v51 = vsel %vm805_vm8, %v3096_v49, %v2479_v46  ;;  %vm996_vm8 = vcmask 293888  }
  0xd4   : > { %3132 = vst [vmem:[#allocation17_spill] sm:$0xff] %v2467_v34  ;;  %v443_v45 = vrot.slane %v2467_v34, 4 }
  0xd6   : > { %v445_v48 = vsel %vm444_vm1, %v2476_v44, %v443_v45  ;;  %v2114_v45 = vmov 0.0   ;;  %v2115_v44 = vmov 839922192  }
  0xd7   : > { %446 = vrot.lane.b32.xlu0 %v445_v48, %s2088_s6  ;;  %438 = vst.msk [vmem:[#allocation2] sm:$0xf] %vm437_vm14, %v2114_v45  ;;  %s2119_s6 = smov 111  }
  0xd8   : > { %v2495_v53 = vpop.permute.xlu1 %812  ;;  %440 = vst.msk [vmem:[#allocation2 + $0x8] sm:$0xf] %vm439_vm15, %v2114_v45  ;;  %vm1379_vm15 = vcmask 556032  }
  0xda   : > { %v2504_v58 = vpop.permute.xlu0 %1003  ;;  %v2530_v18 = vpop.permute.xlu2 %927 }
  0xe0   : > { %v2501_v0 = vpop.permute.xlu1 %918 }
  0xe1   : > { %v3093_v57 = vrot.slane %v2501_v0, 4 }
  0xe2   : > { %v2517_v9 = vpop.permute.xlu0 %1147  ;;  %v2534_v20 = vpop.permute.xlu2 %1033 }
  0xe3   : > { %v2510_v4 = vsel %vm449_vm9, %v3093_v57, %v2501_v0  ;;  %v3097_v15 = vrot.slane %v2517_v9, 4  ;;  %3135 = vst [vmem:[#allocation20_spill] sm:$0xff] %v2534_v20  ;;  %v3092_v24 = vrot.slane %v2534_v20, 4 }
  0xe5   : > { %v2528_v16 = vsel %vm1150_vm11, %v3097_v15, %v2517_v9  ;;  %v2542_v63 = vsel %vm1036_vm12, %v3092_v24, %v2534_v20  ;;  %v995_v20 = vrot.slane %v2497_v54, 4  ;;  %vm883_vm11 = vcmask 269312  }
  0xe6   : > { %vm1112_vm12 = vcmask 408576  }
  0xe8   : > { %v2514_v62 = vpop.permute.xlu1 %955 }
  0xe9   : > { %3134 = vst [vmem:[#allocation19_spill] sm:$0xff] %v2514_v62  ;;  %v3091_v7 = vrot.slane %v2514_v62, 4 }
  0xea   : > { %v2550_v33 = vpop.permute.xlu2 %1043  ;;  %v2559_v24 = vpop.permute.xlu0 %1157 }
  0xeb   : > { %v2522_v13 = vsel %vm958_vm10, %v3091_v7, %v2514_v62  ;;  %vm767_vm10 = vcmask 154624  }
  0xf0   : > { %v2532_v19 = vpop.permute.xlu1 %965 }
  0xf2   : > { %v2571_v45 = vpop.permute.xlu0 %1300 }
  0xf3   : > { %v2555_v48 = vpop.permute.xlu2 %1081  ;;  %v3106_v15 = vrot.slane %v2571_v45, 4 }
  0xf5   : > { %v2577_v60 = vsel %vm1303_vm2, %v3106_v15, %v2571_v45  ;;  %v475_v15 = vunpack.c.l.s4 %v2115_v44  ;;  %v3143_v44 = vrot.slane %v2405_v41, 4  ;;  %vm559_vm2 = vcmask 1031168  }
  0xf8   : > { %v2537_v10 = vpop.permute.xlu1 %1071 }
  0xf9   : > { %3136 = vst [vmem:[#allocation21_spill] sm:$0xff] %v2537_v10  ;;  %v3094_v6 = vrot.slane %v2537_v10, 4 }
  0xfa   : > { %v2587_v43 = vpop.permute.xlu0 %1310 }
  0xfb   : > { %v2548_v31 = vsel %vm1074_vm13, %v3094_v6, %v2537_v10  ;;  %vm1228_vm13 = vcmask 523264  }
  0xfc   : > { %v2561_v57 = vpop.permute.xlu2 %1185 }
  0xfd   : > { %3139 = vst [vmem:[#allocation24_spill] sm:$0xff] %v2561_v57  ;;  %v3101_v6 = vrot.slane %v2561_v57, 4 }
  0xff   : > { %v2569_v49 = vsel %vm1188_vm0, %v3101_v6, %v2561_v57  ;;  %vm519_vm0 = vcmask 1039360  }
 0x100   : > { %v2552_v42 = vpop.permute.xlu1 %1109 }
 0x101   : > { %3137 = vst [vmem:[#allocation22_spill] sm:$0xff] %v2552_v42 }
 0x108   : > { %v2557_v7 = vpop.permute.xlu1 %1119 }
 0x109   : > { %3138 = vst [vmem:[#allocation23_spill] sm:$0xff] %v2557_v7 }
 0x110   : > { %v2564_v25 = vpop.permute.xlu1 %1225 }
 0x111   : > { %3140 = vst [vmem:[#allocation25_spill] sm:$0xff] %v2564_v25  ;;  %v2591_v25 = vunpack.c.0.s8 %v475_v15 }
 0x113   : > { %v2598_v7 = vperm.slane %v2391_v28, %v2591_v25  ;;  %v2602_v10 = vperm.slane %v2413_v47, %v2591_v25  ;;  %v2612_v15 = vperm.slane %v2384_v22, %v2591_v25  ;;  %v2616_v28 = vperm.slane %v2450_v17, %v2591_v25 }
 0x114   : > { %v3144_v47 = vrot.slane %v2428_v1, 4  ;;  %v625_v17 = vperm.slane %v2423_v56, %v2591_v25  ;;  %v652_v1 = vrot.slane %v2443_v12, 4 }
 0x118   : > { %v2579_v32 = vpop.permute.xlu1 %1262 }
 0x119   : > { %3141 = vst [vmem:[#allocation26_spill] sm:$0xff] %v2579_v32  ;;  %v3109_v3 = vrot.slane %v2579_v32, 4 }
 0x11b   : > { %v2585_v6 = vsel %vm1265_vm3, %v3109_v3, %v2579_v32  ;;  %v493_v3 = vrot.slane %v2393_v29, 4  ;;  %vm599_vm3 = vcmask 1022976  }
 0x11d   : > { %v495_v22 = vsel %vm494_vm7, %v493_v3, %v2393_v29  ;;  %v3145_v29 = vrot.slane %v2464_v30, 4  ;;  %v817_v30 = vperm.slane %v2495_v53, %v2591_v25  ;;  %v2673_v53 = vperm.slane %v2530_v18, %v2591_v25  ;;  %v1196_v18 = vpop.permute.xlu2 %1195 }
 0x11e   : > { %vm754_vm7 = vcmask 900096  }
 0x149   : > { %v447_v40 = vpop.permute.xlu0 %446 }
 0x14a   : > { %v448_v34 = vrot.slane %v447_v40, 4 }
 0x14c   : > { %v450_v57 = vsel %vm449_vm9, %v448_v34, %v447_v40  ;;  %457 = vst.msk [vmem:[#allocation2 + $0x8] sm:$0xf] %vm437_vm14, %v448_v34  ;;  %v3142_v40 = vrot.slane %v2400_v35, 4  ;;  %vm653_vm9 = vcmask 130048   ;;  %vm1341_vm14 = vcmask 547840  }
 0x14d   : > { %456 = vst.msk [vmem:[#allocation2] sm:$0xff] %vm455_vm6, %v450_v57  ;;  %vm716_vm6 = vcmask 908288  }
 0x153   : > { %v2594_v32 = vld [vmem:[#allocation2 + $0x8] sm:$0xf] }
 0x154   : > { %v579_v34 = vmul.f32 %v3142_v40, %v2594_v32  ;;  %v539_v57 = vmul.f32 %v3143_v44, %v2594_v32  ;;  %v499_v42 = vmul.f32 %v493_v3, %v2594_v32  ;;  %v696_v62 = vmul.f32 %v3144_v47, %v2594_v32 }
 0x155   : > { %v850_v56 = vmul.f32 %v3145_v29, %v2594_v32  ;;  %v2643_v3 = vperm.slane %v2448_v14, %v2591_v25  ;;  %v2653_v47 = vperm.slane %v2493_v52, %v2591_v25  ;;  %v658_v14 = vmul.f32 %v652_v1, %v2594_v32  ;;  %v2694_v29 = vld [vmem:[#allocation2] sm:$0xff] }
 0x156   : > { %v589_v35 = vmul.f32 %v2602_v10, %v579_v34  ;;  %v549_v40 = vmul.f32 %v2598_v7, %v539_v57  ;;  %v509_v41 = vmul.f32 %v2612_v15, %v499_v42  ;;  %v706_v44 = vmul.f32 %v2616_v28, %v696_v62 }
 0x157   : > { %v2635_v42 = vperm.slane %v2485_v50, %v2591_v25  ;;  %v766_v62 = vrot.slane %v2456_v26, 4  ;;  %v741_v34 = vperm.slane %v2474_v38, %v2591_v25  ;;  %v3146_v50 = vrot.slane %v2425_v59, 4 }
 0x158   : > { %594 = vrot.lane.b32.xlu2 %v589_v35, %s2116_s25  ;;  %554 = vrot.lane.b32.xlu1 %v549_v40, %s2117_s1  ;;  %v997_v38 = vsel %vm996_vm8, %v995_v20, %v2497_v54  ;;  %v1008_v59 = vperm.slane %v2504_v58, %v2591_v25  ;;  %v1001_v40 = vmul.f32 %v995_v20, %v2594_v32  ;;  %v3147_v58 = vrot.slane %v2517_v9, 4 }
 0x159   : > { %514 = vrot.lane.b32.xlu0 %v509_v41, %s2118_s3  ;;  %v618_v57 = vmul.f32 %v3146_v50, %v2594_v32  ;;  %v2661_v35 = vmul.f32 %v2635_v42, %v850_v56  ;;  %v2669_v52 = vmul.f32 %v2323_v36, %v2297_v5  ;;  %v2677_v41 = vperm.slane %v2532_v19, %v2591_v25  ;;  %v1273_v50 = vpop.permute.xlu1 %1272 }
 0x15a   : > { %v2681_v54 = vperm.slane %v2559_v24, %v2591_v25  ;;  %v1155_v20 = vmul.f32 %v3147_v58, %v2594_v32  ;;  %v2688_v5 = vperm.slane %v2550_v33, %v2591_v25  ;;  %v2692_v36 = vperm.slane %v2555_v48, %v2591_v25 }
 0x15b   : > { %v628_v19 = vmul.f32 %v625_v17, %v618_v57  ;;  %v2696_v56 = vmul.f32 %v1008_v59, %v1001_v40  ;;  %v2699_v24 = vperm.slane %v1196_v18, %v2591_v25  ;;  %v2703_v9 = vperm.slane %v2587_v43, %v2591_v25 }
 0x15c   : > { %v668_v33 = vmul.f32 %v2643_v3, %v658_v14  ;;  %v2707_v58 = vmul.f32 %v2681_v54, %v1155_v20  ;;  %v2710_v48 = vperm.slane %v1273_v50, %v2591_v25  ;;  %v3148_v57 = vrot.slane %v2571_v45, 4 }
 0x15d   : > { %v464_v40 = vperm.slane %v2669_v52, 0  ;;  %v465_v14 = vperm.slane %v2669_v52, 1  ;;  %v3149_v20 = vrot.slane %v2479_v46, 4  ;;  %v538_v45 = vmul.f32 %v2419_v21, %v2694_v29 }
 0x15e   : > { %v1308_v43 = vmul.f32 %v3148_v57, %v2594_v32  ;;  %v3150_v50 = vrot.slane %v2453_v8, 4  ;;  %v617_v46 = vmul.f32 %v2434_v2, %v2694_v29  ;;  %v809_v2 = vmul.f32 %v2490_v51, %v2694_v29 }
 0x15f   : > { %v810_v18 = vmul.f32 %v3149_v20, %v2594_v32  ;;  %v2748_v8 = vmul.f32 %v2598_v7, %v538_v45  ;;  %v466_v20 = vrot.slane %v465_v14, 4  ;;  %v849_v7 = vmul.f32 %v2472_v37, %v2694_v29 }
 0x160   : > { %711 = vrot.lane.b32.xlu2 %v706_v44, %s2119_s6  ;;  %633 = vrot.lane.b32.xlu1 %v628_v19, %s2120_s17  ;;  %v498_v44 = vmul.f32 %v495_v22, %v2694_v29  ;;  %v578_v19 = vmul.f32 %v2411_v39, %v2694_v29  ;;  %v734_v57 = vmul.f32 %v3150_v50, %v2594_v32  ;;  %v882_v37 = vrot.slane %v2499_v55, 4 }
 0x161   : > { %673 = vrot.lane.b32.xlu0 %v668_v33, %s2121_s26  ;;  %v2732_v52 = vmul.f32 %v2703_v9, %v1308_v43  ;;  %v695_v33 = vmul.f32 %v2441_v11, %v2694_v29  ;;  %v772_v39 = vmul.f32 %v766_v62, %v2594_v32  ;;  %v2753_v11 = vmul.f32 %v625_v17, %v617_v46 }
 0x162   : > { %v2742_v22 = vmul.f32 %v2612_v15, %v498_v44  ;;  %v2745_v21 = vmul.f32 %v2602_v10, %v578_v19  ;;  %v820_v50 = vmul.f32 %v817_v30, %v810_v18  ;;  %v733_v15 = vmul.f32 %v2461_v27, %v2694_v29 }
 0x163   : > { %v2751_v43 = vmul.f32 %v2616_v28, %v695_v33  ;;  %v924_v10 = vmul.f32 %v2510_v4, %v2694_v29  ;;  %v744_v44 = vmul.f32 %v741_v34, %v734_v57  ;;  %v2763_v19 = vmul.f32 %v817_v30, %v809_v2 }
 0x164   : > { %v1000_v28 = vmul.f32 %v997_v38, %v2694_v29  ;;  %v1040_v17 = vmul.f32 %v2542_v63, %v2694_v29  ;;  %v782_v51 = vmul.f32 %v2653_v47, %v772_v39  ;;  %v2769_v14 = vmul.f32 %v741_v34, %v733_v15 }
 0x165   : > { %v2772_v27 = vmul.f32 %v2673_v53, %v924_v10  ;;  %v2775_v4 = vmul.f32 %v2635_v42, %v849_v7  ;;  %v962_v34 = vmul.f32 %v2522_v13, %v2694_v29  ;;  %v3151_v42 = vrot.slane %v2501_v0, 4  ;;  %v1236_v7 = vpop.permute.xlu2 %1235 }
 0x166   : > { %v2780_v30 = vmul.f32 %v1008_v59, %v1000_v28  ;;  %v2783_v63 = vmul.f32 %v2688_v5, %v1040_v17  ;;  %v1154_v18 = vmul.f32 %v2528_v16, %v2694_v29  ;;  %v1078_v59 = vmul.f32 %v2548_v31, %v2694_v29  ;;  %v3156_v17 = vld [vmem:[#allocation22_spill] sm:$0xff] }
 0x167   : > { %v925_v38 = vmul.f32 %v3151_v42, %v2594_v32  ;;  %v467_v45 = vsel %vm444_vm1, %v464_v40, %v466_v20  ;;  %v2797_v57 = vmul.f32 %v2677_v41, %v962_v34  ;;  %v1269_v13 = vmul.f32 %v2585_v6, %v2694_v29 }
 0x168   : > { %825 = vrot.lane.b32.xlu2 %v820_v50, %s2122_s13  ;;  %749 = vrot.lane.b32.xlu1 %v744_v44, %s2123_s19  ;;  %v1192_v33 = vmul.f32 %v2569_v49, %v2694_v29  ;;  %v1307_v0 = vmul.f32 %v2577_v60, %v2694_v29  ;;  %v477_v16 = vperm.slane %v2386_v23, %v2591_v25  ;;  %vm792_vm8 = vcmask 891904  }
 0x169   : > { %787 = vrot.lane.b32.xlu0 %v782_v51, %s2124_s21  ;;  %v888_v31 = vmul.f32 %v882_v37, %v2594_v32  ;;  %v2811_v40 = vmul.f32 %v2681_v54, %v1154_v18  ;;  %v2814_v46 = vmul.f32 %v2692_v36, %v1078_v59  ;;  %v2817_v6 = vmul.f32 %v2710_v48, %v1269_v13 }
 0x16a   : > { %v2820_v49 = vmul.f32 %v2699_v24, %v1192_v33  ;;  %v2823_v60 = vmul.f32 %v2703_v9, %v1307_v0  ;;  %v469_v23 = vmul.f32 %v2694_v29, %v467_v45  ;;  %v2828_v39 = vperm.slane %v2512_v61, %v2591_v25  ;;  %v3152_v9 = vld [vmem:[#allocation20_spill] sm:$0xff]  ;;  %v3160_v45 = vld [vmem:[#allocation25_spill] sm:$0xff]  ;;  %v3161_v33 = vld [vmem:[#allocation26_spill] sm:$0xff] }
 0x16b   : > { %v935_v54 = vmul.f32 %v2673_v53, %v925_v38  ;;  %v3153_v61 = vrot.slane %v3152_v9, 4  ;;  %v3154_v53 = vld [vmem:[#allocation19_spill] sm:$0xff]  ;;  %v1111_v51 = vrot.slane %v3156_v17, 4  ;;  %v1227_v13 = vrot.slane %v3160_v45, 4 }
 0x16c   : > { %v2831_v2 = vmul.f32 %v477_v16, %v469_v23  ;;  %v898_v20 = vmul.f32 %v2828_v39, %v888_v31  ;;  %v3155_v15 = vrot.slane %v3154_v53, 4  ;;  %v3162_v0 = vrot.slane %v3161_v33, 4 }
 0x16d   : > { %v1041_v50 = vmul.f32 %v3153_v61, %v2594_v32  ;;  %v2861_v18 = vpop.permute.xlu2 %1338 }
 0x16e   : > { %v963_v10 = vmul.f32 %v3155_v15, %v2594_v32  ;;  %v1270_v16 = vmul.f32 %v3162_v0, %v2594_v32  ;;  %v1340_v61 = vrot.slane %v2861_v18, 4 }
 0x16f   : > { %v1051_v44 = vmul.f32 %v2688_v5, %v1041_v50  ;;  %v3159_v5 = vld [vmem:[#allocation23_spill] sm:$0xff] }
 0x170   : > { %940 = vrot.lane.b32.xlu2 %v935_v54, %s2125_s23  ;;  %865 = vrot.lane.b32.xlu1 %v2661_v35, %s3117_s10  ;;  %v973_v28 = vmul.f32 %v2677_v41, %v963_v10  ;;  %v3157_v35 = vld [vmem:[#allocation21_spill] sm:$0xff]  ;;  %v2856_v38 = vperm.slane %v3159_v5, %v2591_v25  ;;  %v1117_v41 = vmul.f32 %v1111_v51, %v2594_v32  ;;  %s3120_s10 = smov 78  }
 0x171   : > { %903 = vrot.lane.b32.xlu0 %v898_v20, %s2127_s12  ;;  %v3158_v34 = vrot.slane %v3157_v35, 4  ;;  %v1240_v54 = vperm.slane %v1236_v7, %v2591_v25  ;;  %v1233_v20 = vmul.f32 %v1227_v13, %v2594_v32  ;;  %v1346_v15 = vmul.f32 %v1340_v61, %v2594_v32 }
 0x173   : > { %v1079_v42 = vmul.f32 %v3158_v34, %v2594_v32  ;;  %v1243_v50 = vmul.f32 %v1240_v54, %v1233_v20 }
 0x175   : > { %v1089_v59 = vmul.f32 %v2692_v36, %v1079_v42  ;;  %v3163_v36 = vld [vmem:[#allocation24_spill] sm:$0xff]  ;;  %v1349_v53 = vpop.permute.xlu2 %1348 }
 0x176   : > { %v3164_v31 = vrot.slane %v3163_v36, 4  ;;  %v1353_v10 = vperm.slane %v1349_v53, %v2591_v25 }
 0x178   : > { %1056 = vrot.lane.b32.xlu2 %v1051_v44, %s3116_s18  ;;  %978 = vrot.lane.b32.xlu1 %v973_v28, %s3115_s20  ;;  %s3119_s20 = smov 77   ;;  %s3118_s18 = smov 79   ;;  %v1193_v23 = vmul.f32 %v3164_v31, %v2594_v32 }
 0x179   : > { %1016 = vrot.lane.b32.xlu0 %v2696_v56, %s2130_s22  ;;  %v1127_v56 = vmul.f32 %v2856_v38, %v1117_v41 }
 0x17a   : > { %v1203_v9 = vmul.f32 %v2699_v24, %v1193_v23  ;;  %v654_v24 = vsel %vm653_vm9, %v652_v1, %v2443_v12  ;;  %vm830_vm9 = vcmask 883712  }
 0x17b   : > { %v657_v7 = vmul.f32 %v654_v24, %v2694_v29 }
 0x17d   : > { %v667_v44 = vmul.f32 %v2643_v3, %v657_v7  ;;  %v884_v3 = vsel %vm883_vm11, %v882_v37, %v2499_v55  ;;  %v1113_v55 = vsel %vm1112_vm12, %v1111_v51, %v3156_v17  ;;  %vm908_vm11 = vcmask 777216  }
 0x17e   : > { %vm945_vm12 = vcmask 769024  }
 0x180   : > { %1170 = vrot.lane.b32.xlu2 %v2707_v58, %s3119_s20  ;;  %1094 = vrot.lane.b32.xlu1 %v1089_v59, %s3118_s18  ;;  %v1280_v58 = vmul.f32 %v2710_v48, %v1270_v16  ;;  %s2134_s18 = smov 63   ;;  %s3121_s20 = smov 76   ;;  %v1356_v48 = vmul.f32 %v1353_v10, %v1346_v15 }
 0x181   : > { %1132 = vrot.lane.b32.xlu0 %v1127_v56, %s3120_s10  ;;  %s2136_s10 = smov 62  }
 0x188   : > { %1285 = vrot.lane.b32.xlu2 %v1280_v58, %s2134_s18  ;;  %1208 = vrot.lane.b32.xlu1 %v1203_v9, %s3121_s20  ;;  %s2137_s20 = smov 61  }
 0x189   : > { %1248 = vrot.lane.b32.xlu0 %v1243_v50, %s2100_s24 }
 0x190   : > { %1323 = vrot.lane.b32.xlu1 %v2732_v52, %s2136_s10  ;;  %512 = vrot.lane.b32.xlu2 %v2742_v22, %s2118_s3  ;;  %v768_v52 = vsel %vm767_vm10, %v766_v62, %v2456_v26  ;;  %v887_v26 = vmul.f32 %v884_v3, %v2694_v29  ;;  %v1116_v22 = vmul.f32 %v1113_v55, %v2694_v29  ;;  %s3167_s3 = smov 78   ;;  %vm870_vm10 = vcmask 785408  }
 0x191   : > { %1361 = vrot.lane.b32.xlu0 %v1356_v48, %s2137_s20  ;;  %v771_v12 = vmul.f32 %v768_v52, %v2694_v29 }
 0x192   : > { %v897_v62 = vmul.f32 %v2828_v39, %v887_v26 }
 0x193   : > { %v781_v1 = vmul.f32 %v2653_v47, %v771_v12 }
 0x198   : > { %592 = vrot.lane.b32.xlu1 %v2745_v21, %s2116_s25  ;;  %671 = vrot.lane.b32.xlu2 %v667_v44, %s2121_s26  ;;  %s3165_s25 = smov 96   ;;  %v1126_v21 = vmul.f32 %v2856_v38, %v1116_v22  ;;  %s3170_s26 = smov 79  }
 0x199   : > { %552 = vrot.lane.b32.xlu0 %v2748_v8, %s2117_s1  ;;  %v1229_v8 = vsel %vm1228_vm13, %v1227_v13, %v3160_v45  ;;  %s3166_s1 = smov 80  }
 0x1a0   : > { %709 = vrot.lane.b32.xlu1 %v2751_v43, %s2119_s6  ;;  %785 = vrot.lane.b32.xlu2 %v781_v1, %s2124_s21  ;;  %v1377_v43 = vpop.permute.xlu1 %1376  ;;  %s3168_s6 = smov 93  }
 0x1a1   : > { %631 = vrot.lane.b32.xlu0 %v2753_v11, %s2120_s17  ;;  %s3169_s17 = smov 77  }
 0x1a8   : > { %823 = vrot.lane.b32.xlu1 %v2763_v19, %s2122_s13  ;;  %901 = vrot.lane.b32.xlu2 %v897_v62, %s2127_s12  ;;  %v1232_v19 = vmul.f32 %v1229_v8, %v2694_v29  ;;  %v1387_v37 = vpop.permute.xlu1 %1386  ;;  %s3171_s13 = smov 76   ;;  %s1630_s12 = sshll.u32 %s2205_s9, 3 }
 0x1a9   : > { %747 = vrot.lane.b32.xlu0 %v2769_v14, %s2123_s19  ;;  %v1391_v28 = vperm.slane %v1387_v37, %v2591_v25 }
 0x1aa   : > { %v1242_v14 = vmul.f32 %v1240_v54, %v1232_v19 }
 0x1b0   : > { %938 = vrot.lane.b32.xlu1 %v2772_v27, %s2125_s23  ;;  %1014 = vrot.lane.b32.xlu2 %v2780_v30, %s2130_s22  ;;  %v1342_v27 = vsel %vm1341_vm14, %v1340_v61, %v2861_v18  ;;  %vm983_vm14 = vcmask 760832   ;;  %s369_s23 = sand.u32 1, %s2050_s28   ;;  %s1489_s22 = scalar_lea.hbm %s3090_s8, %s1630_s12 }
 0x1b1   : > { %863 = vrot.lane.b32.xlu0 %v2775_v4, %s3165_s25  ;;  %v1345_v4 = vmul.f32 %v1342_v27, %v2694_v29 }
 0x1b2   : > { %v2930_v47 = vpop.permute.xlu2 %594 }
 0x1b3   : > { %v597_v24 = vrot.slane %v2930_v47, 4 }
 0x1b8   : > { %1054 = vrot.lane.b32.xlu1 %v2783_v63, %s3166_s1  ;;  %1130 = vrot.lane.b32.xlu2 %v1126_v21, %s3167_s3  ;;  %v1378_v63 = vrot.slane %v1377_v43, 4  ;;  %s1493_s3 = sshll.u32 %s1489_s22, 4  ;;  %s1494_s3 = int_to_ptr.hbm [resolvable:$true] %s1493_s3 }
 0x1b9   : > { %976 = vrot.lane.b32.xlu0 %v2797_v57, %s3168_s6  ;;  %v1355_v57 = vmul.f32 %v1353_v10, %v1345_v4  ;;  %s1478_s6 = scalar_lea.sflag [#allocation5], %s369_s23 }
 0x1ba   : > { %v2941_v11 = vpop.permute.xlu2 %711  ;;  %v1380_v39 = vsel %vm1379_vm15, %v1378_v63, %v1377_v43  ;;  %vm1021_vm15 = vcmask 752640  }
 0x1c0   : > { %1168 = vrot.lane.b32.xlu1 %v2811_v40, %s3169_s17  ;;  %1246 = vrot.lane.b32.xlu2 %v1242_v14, %s2100_s24  ;;  %v1383_v40 = vmul.f32 %v1380_v39, %v2694_v29  ;;  %s2138_s24 = smov 60   ;;  %v714_v14 = vrot.slane %v2941_v11, 4  ;;  %s1998_s17 = sshra.s32 %s1494_s3, 4  ;;  %s1999_s17 = int_to_ptr.hbm [resolvable:$true] %s1998_s17 }
 0x1c1   : > { %1092 = vrot.lane.b32.xlu0 %v2814_v46, %s3170_s26  ;;  %v1384_v46 = vmul.f32 %v1378_v63, %v2594_v32  ;;  %v1408_v32 = vld [vmem:[%s3086_s4] sm:$0xf]  ;;  %s2000_s9 = scalar_lea.hbm %s1999_s17, 8  ;;  %p2005_p3 = scmp.lt.s32.totalorder %s1999_s17, %s3090_s8 }
 0x1c2   : > { %v2951_v30 = vpop.permute.xlu2 %825  ;;  %v1393_v34 = vmul.f32 %v1391_v28, %v1383_v40  ;;  %p2001_p0 = scmp.ne.s32.totalorder %s1999_s17, %s2000_s9 }
 0x1c3   : > { %v1394_v42 = vmul.f32 %v1391_v28, %v1384_v46 }
 0x1c4   : > { %p2002_p1 = pnand %p2001_p0, %p2222_p5 }
 0x1c6   : > { %p2003_p2 = pneg %p2002_p1 }
 0x1c8   : > { %1283 = vrot.lane.b32.xlu1 %v2817_v6, %s2134_s18  ;;  %1359 = vrot.lane.b32.xlu2 %v1355_v57, %s2137_s20 }
 0x1c9   : > { %1206 = vrot.lane.b32.xlu0 %v2820_v49, %s3171_s13 }
 0x1ca   : > { %v2961_v17 = vpop.permute.xlu2 %940  ;;  %v555_v51 = vpop.permute.xlu1 %554 }
 0x1cb   : > { %v515_v35 = vpop.permute.xlu0 %514 }
 0x1cc   : > { %v517_v56 = vrot.slane %v515_v35, 4 }
 0x1d0   : > { %1397 = vrot.lane.b32.xlu1 %v1393_v34, %s2138_s24  ;;  %1399 = vrot.lane.b32.xlu2 %v1394_v42, %s2138_s24  ;;  %s2004_s24 = scalar_lea.hbm %s3090_s8, 16 }
 0x1d1   : > { %1321 = vrot.lane.b32.xlu0 %v2823_v60, %s2136_s10  ;;  %s1617_s10 = sshll.u32 %s369_s23, 3  ;;  %p2006_p4 = scmp.lt.s32.totalorder %s2004_s24, %s2000_s9 }
 0x1d2   : > { %v2965_v6 = vpop.permute.xlu2 %1056  ;;  %v634_v49 = vpop.permute.xlu1 %633  ;;  %s371_s25 = scalar_lea.vmem [#allocation12], %s1617_s10 }
 0x1d3   : > { %v674_v29 = vpop.permute.xlu0 %673  ;;  %v636_v21 = vrot.slane %v634_v49, 4  ;;  %s1491_s1 = sshll.u32 %s371_s25, 4  ;;  %p2007_p7 = por %p2006_p4, %p2005_p3  ;;  %s1492_s1 = int_to_ptr.vmem [resolvable:$true] %s1491_s1 }
 0x1d4   : > { %v676_v43 = vrot.slane %v674_v29, 4 }
 0x1d5   : > { %p2008_p8 = pnand %p2007_p7, %p2003_p2 }
 0x1d9   : > { %1411 = vperm.xlu0 %1821, %v1408_v32  }
 0x1da   : > { %v2970_v5 = vpop.permute.xlu2 %1170  ;;  %v2972_v38 = vpop.permute.xlu1 %749 }
 0x1db   : > { %v2974_v41 = vpop.permute.xlu0 %787 }
 0x1dc   : > { %v790_v35 = vrot.slane %v2974_v41, 4 }
 0x1e2   : > { %v2976_v18 = vpop.permute.xlu2 %1285  ;;  %v2978_v59 = vpop.permute.xlu1 %865 }
 0x1e3   : > { %v2980_v60 = vpop.permute.xlu0 %903 }
 0x1ea   : > { %v2982_v45 = vpop.permute.xlu1 %978  ;;  %v513_v13 = vpop.permute.xlu2 %512 }
 0x1eb   : > { %v2984_v33 = vpop.permute.xlu0 %1016  ;;  %v516_v0 = vrot.slane %v513_v13, 4 }
 0x1ed   : > { %v518_v16 = vsel %vm444_vm1, %v516_v0, %v517_v56 }
 0x1ee   : > { %v520_v36 = vsel %vm519_vm0, %v513_v13, %v518_v16  ;;  %v828_v13 = vrot.slane %v2951_v30, 4  ;;  %vm1061_vm0 = vcmask 654336  }
 0x1ef   : > { %v522_v31 = vadd.f32 %v520_v36, %v2831_v2  ;;  %v557_v2 = vrot.slane %v555_v51, 4  ;;  %v752_v51 = vrot.slane %v2972_v38, 4 }
 0x1f2   : > { %v2988_v23 = vpop.permute.xlu1 %1094  ;;  %v672_v9 = vpop.permute.xlu2 %671 }
 0x1f3   : > { %v2990_v54 = vpop.permute.xlu0 %1132  ;;  %v675_v62 = vrot.slane %v672_v9, 4 }
 0x1f5   : > { %v677_v27 = vsel %vm444_vm1, %v675_v62, %v676_v43  ;;  %v1019_v43 = vrot.slane %v2984_v33, 4 }
 0x1f6   : > { %v679_v39 = vsel %vm678_vm5, %v672_v9, %v677_v27  ;;  %vm1213_vm5 = vcmask 621568  }
 0x1fa   : > { %v2992_v20 = vpop.permute.xlu1 %1208  ;;  %v786_v53 = vpop.permute.xlu2 %785 }
 0x1fb   : > { %v2994_v58 = vpop.permute.xlu0 %1248  ;;  %v789_v40 = vrot.slane %v786_v53, 4 }
 0x1fd   : > { %v791_v56 = vsel %vm444_vm1, %v789_v40, %v790_v35  ;;  %v1135_v35 = vrot.slane %v2990_v54, 4 }
 0x1fe   : > { %v793_v41 = vsel %vm792_vm8, %v786_v53, %v791_v56  ;;  %vm1366_vm8 = vcmask 498688  }
 0x202   : > { %v2996_v61 = vpop.permute.xlu1 %1323  ;;  %v902_v3 = vpop.permute.xlu2 %901 }
 0x203   : > { %v2998_v50 = vpop.permute.xlu0 %1361 }
 0x20a   : > { %v593_v15 = vpop.permute.xlu1 %592  ;;  %v1015_v34 = vpop.permute.xlu2 %1014 }
 0x20b   : > { %v596_v10 = vrot.slane %v593_v15, 4  ;;  %v553_v48 = vpop.permute.xlu0 %552 }
 0x20c   : > { %v556_v7 = vrot.slane %v553_v48, 4 }
 0x20d   : > { %v598_v44 = vsel %vm444_vm1, %v596_v10, %v597_v24  ;;  %v868_v10 = vrot.slane %v2978_v59, 4 }
 0x20e   : > { %v558_v52 = vsel %vm444_vm1, %v556_v7, %v557_v2  ;;  %v600_v26 = vsel %vm599_vm3, %v593_v15, %v598_v44  ;;  %vm1137_vm3 = vcmask 637952  }
 0x20f   : > { %v560_v12 = vsel %vm559_vm2, %v553_v48, %v558_v52  ;;  %v906_v48 = vrot.slane %v2980_v60, 4  ;;  %vm1099_vm2 = vcmask 646144  }
 0x210   : > { %v562_v1 = vadd.f32 %v560_v12, %v522_v31  ;;  %v905_v31 = vrot.slane %v902_v3, 4  ;;  %v943_v12 = vrot.slane %v2961_v17, 4 }
 0x212   : > { %v710_v55 = vpop.permute.xlu1 %709  ;;  %v602_v22 = vadd.f32 %v600_v26, %v562_v1  ;;  %v1131_v52 = vpop.permute.xlu2 %1130  ;;  %v907_v1 = vsel %vm444_vm1, %v905_v31, %v906_v48  ;;  %v1211_v31 = vrot.slane %v2992_v20, 4 }
 0x213   : > { %v632_v8 = vpop.permute.xlu0 %631  ;;  %v713_v19 = vrot.slane %v710_v55, 4  ;;  %v909_v60 = vsel %vm908_vm11, %v902_v3, %v907_v1  ;;  %v1134_v40 = vrot.slane %v1131_v52, 4 }
 0x214   : > { %v635_v47 = vrot.slane %v632_v8, 4 }
 0x215   : > { %v715_v63 = vsel %vm444_vm1, %v713_v19, %v714_v14 }
 0x216   : > { %v637_v4 = vsel %vm444_vm1, %v635_v47, %v636_v21  ;;  %v717_v11 = vsel %vm716_vm6, %v710_v55, %v715_v63  ;;  %v1018_v55 = vrot.slane %v1015_v34, 4  ;;  %vm1290_vm6 = vcmask 515072  }
 0x217   : > { %v639_v37 = vsel %vm638_vm4, %v632_v8, %v637_v4  ;;  %v981_v8 = vrot.slane %v2982_v45, 4  ;;  %v1059_v4 = vrot.slane %v2965_v6, 4  ;;  %vm1175_vm4 = vcmask 629760  }
 0x218   : > { %v641_v57 = vadd.f32 %v639_v37, %v602_v22  ;;  %v1020_v37 = vsel %vm444_vm1, %v1018_v55, %v1019_v43 }
 0x219   : > { %v1022_v33 = vsel %vm1021_vm15, %v1015_v34, %v1020_v37 }
 0x21a   : > { %v681_v46 = vadd.f32 %v679_v39, %v641_v57  ;;  %v824_v28 = vpop.permute.xlu1 %823  ;;  %v1247_v63 = vpop.permute.xlu2 %1246 }
 0x21b   : > { %v748_v42 = vpop.permute.xlu0 %747  ;;  %v827_v49 = vrot.slane %v824_v28, 4 }
 0x21c   : > { %v719_v29 = vadd.f32 %v717_v11, %v681_v46  ;;  %v751_v32 = vrot.slane %v748_v42, 4 }
 0x21d   : > { %v829_v38 = vsel %vm444_vm1, %v827_v49, %v828_v13  ;;  %v1136_v13 = vsel %vm444_vm1, %v1134_v40, %v1135_v35  ;;  %v3172_v35 = vld [vmem:[#allocation18_spill] sm:$0xff] }
 0x21e   : > { %v753_v0 = vsel %vm444_vm1, %v751_v32, %v752_v51  ;;  %v831_v24 = vsel %vm830_vm9, %v824_v28, %v829_v38  ;;  %v1097_v51 = vrot.slane %v2988_v23, 4  ;;  %v1173_v32 = vrot.slane %v2970_v5, 4 }
 0x21f   : > { %v755_v16 = vsel %vm754_vm7, %v748_v42, %v753_v0  ;;  %v1250_v38 = vrot.slane %v1247_v63, 4  ;;  %vm1328_vm7 = vcmask 506880   ;;  %vm1437_vm9 = vcmask 64512  }
 0x220   : > { %v757_v36 = vadd.f32 %v755_v16, %v719_v29  ;;  %v1138_v16 = vsel %vm1137_vm3, %v1131_v52, %v1136_v13  ;;  %v1436_v13 = vld [vmem:[#allocation8] sm:$0xf] }
 0x222   : > { %v795_v9 = vadd.f32 %v793_v41, %v757_v36  ;;  %v939_v15 = vpop.permute.xlu1 %938  ;;  %v1360_v54 = vpop.permute.xlu2 %1359 }
 0x223   : > { %v864_v30 = vpop.permute.xlu0 %863  ;;  %v942_v2 = vrot.slane %v939_v15, 4 }
 0x224   : > { %v833_v7 = vadd.f32 %v831_v24, %v795_v9  ;;  %v867_v44 = vrot.slane %v864_v30, 4  ;;  %v1251_v9 = vrot.slane %v2994_v58, 4  ;;  %v1363_v58 = vrot.slane %v1360_v54, 4 }
 0x225   : > { %v944_v59 = vsel %vm444_vm1, %v942_v2, %v943_v12 }
 0x226   : > { %v869_v53 = vsel %vm444_vm1, %v867_v44, %v868_v10  ;;  %v946_v19 = vsel %vm945_vm12, %v939_v15, %v944_v59  ;;  %v1252_v2 = vsel %vm444_vm1, %v1250_v38, %v1251_v9  ;;  %v1364_v59 = vrot.slane %v2998_v50, 4 }
 0x227   : > { %v871_v26 = vsel %vm870_vm10, %v864_v30, %v869_v53  ;;  %v1288_v30 = vrot.slane %v2976_v18, 4  ;;  %v1253_v20 = vsel %vm1228_vm13, %v1247_v63, %v1252_v2  ;;  %vm1404_vm13 = vcmask 490496  }
 0x228   : > { %v873_v62 = vadd.f32 %v871_v26, %v833_v7  ;;  %v1326_v26 = vrot.slane %v2996_v61, 4 }
 0x22a   : > { %v911_v22 = vadd.f32 %v909_v60, %v873_v62  ;;  %v1055_v21 = vpop.permute.xlu1 %1054  ;;  %v1400_v62 = vpop.permute.xlu2 %1399 }
 0x22b   : > { %v977_v17 = vpop.permute.xlu0 %976  ;;  %v1058_v47 = vrot.slane %v1055_v21, 4  ;;  %v1402_v43 = vrot.slane %v1400_v62, 4 }
 0x22c   : > { %v948_v14 = vadd.f32 %v946_v19, %v911_v22  ;;  %v980_v27 = vrot.slane %v977_v17, 4 }
 0x22d   : > { %v1060_v45 = vsel %vm444_vm1, %v1058_v47, %v1059_v4 }
 0x22e   : > { %v982_v3 = vsel %vm444_vm1, %v980_v27, %v981_v8  ;;  %v1062_v6 = vsel %vm1061_vm0, %v1055_v21, %v1060_v45  ;;  %v1365_v8 = vsel %vm444_vm1, %v1363_v58, %v1364_v59 }
 0x22f   : > { %v984_v57 = vsel %vm983_vm14, %v977_v17, %v982_v3 }
 0x230   : > { %v986_v39 = vadd.f32 %v984_v57, %v948_v14  ;;  %v1367_v14 = vsel %vm1366_vm8, %v1360_v54, %v1365_v8 }
 0x232   : > { %v1024_v46 = vadd.f32 %v1022_v33, %v986_v39  ;;  %v1169_v28 = vpop.permute.xlu1 %1168 }
 0x233   : > { %v1093_v11 = vpop.permute.xlu0 %1092  ;;  %v1172_v42 = vrot.slane %v1169_v28, 4 }
 0x234   : > { %v1064_v49 = vadd.f32 %v1062_v6, %v1024_v46  ;;  %v1096_v29 = vrot.slane %v1093_v11, 4 }
 0x235   : > { %v1174_v0 = vsel %vm444_vm1, %v1172_v42, %v1173_v32 }
 0x236   : > { %v1098_v34 = vsel %vm444_vm1, %v1096_v29, %v1097_v51  ;;  %v1176_v5 = vsel %vm1175_vm4, %v1169_v28, %v1174_v0 }
 0x237   : > { %v1100_v56 = vsel %vm1099_vm2, %v1093_v11, %v1098_v34  ;;  %v3173_v11 = vld [vmem:[#allocation17_spill] sm:$0xff] }
 0x238   : > { %v1102_v23 = vadd.f32 %v1100_v56, %v1064_v49 }
 0x23a   : > { %v1140_v36 = vadd.f32 %v1138_v16, %v1102_v23  ;;  %v1284_v41 = vpop.permute.xlu1 %1283 }
 0x23b   : > { %v1207_v15 = vpop.permute.xlu0 %1206  ;;  %v1287_v10 = vrot.slane %v1284_v41, 4 }
 0x23c   : > { %v1178_v48 = vadd.f32 %v1176_v5, %v1140_v36  ;;  %v1210_v24 = vrot.slane %v1207_v15, 4 }
 0x23d   : > { %v1289_v52 = vsel %vm444_vm1, %v1287_v10, %v1288_v30 }
 0x23e   : > { %v1212_v7 = vsel %vm444_vm1, %v1210_v24, %v1211_v31  ;;  %v1291_v18 = vsel %vm1290_vm6, %v1284_v41, %v1289_v52 }
 0x23f   : > { %v1214_v44 = vsel %vm1213_vm5, %v1207_v15, %v1212_v7 }
 0x240   : > { %v1216_v12 = vadd.f32 %v1214_v44, %v1178_v48 }
 0x242   : > { %v1255_v1 = vadd.f32 %v1253_v20, %v1216_v12  ;;  %v1398_v53 = vpop.permute.xlu1 %1397 }
 0x243   : > { %v1322_v60 = vpop.permute.xlu0 %1321  ;;  %v1401_v55 = vrot.slane %v1398_v53, 4 }
 0x244   : > { %v1293_v22 = vadd.f32 %v1291_v18, %v1255_v1  ;;  %v1325_v21 = vrot.slane %v1322_v60, 4 }
 0x245   : > { %v1403_v47 = vsel %vm444_vm1, %v1401_v55, %v1402_v43 }
 0x246   : > { %v1327_v19 = vsel %vm444_vm1, %v1325_v21, %v1326_v26  ;;  %v1405_v27 = vsel %vm1404_vm13, %v1398_v53, %v1403_v47 }
 0x247   : > { %v1329_v17 = vsel %vm1328_vm7, %v1322_v60, %v1327_v19 }
 0x248   : > { %v1331_v61 = vadd.f32 %v1329_v17, %v1293_v22 }
 0x24a   : > { %v1369_v50 = vadd.f32 %v1367_v14, %v1331_v61 }
 0x24b   : > { %v1412_v4 = vpop.permute.xlu0 %1411 }
 0x24c   : > { %v1407_v37 = vadd.f32 %v1405_v27, %v1369_v50  ;;  %v1416_v3 = vperm.slane %v1412_v4, %v2591_v25 }
 0x24e   : > { %v1418_v63 = vadd.f32 %v1416_v3, %v1407_v37 }
 0x250   : > { %v1419_v57 = vsub.f32 0.0, %v1418_v63 }
 0x252   : > { %v1420_v45 = vmul.f32 1.442695, %v1419_v57 }
 0x254   : > { %1830 = vpow2.f32 %v1420_v45 }
 0x25a   : > { %v1831_v39 = vpop.eup %1830 }
 0x25b   : > { %v1422_v33 = vadd.f32 1.0, %v1831_v39 }
 0x25d   : > { %1832 = vrcp.f32 %v1422_v33 }
 0x263   : > { %v1833_v40 = vpop.eup %1832 }
 0x264   : > { %v1424_v46 = vmul.f32 %v1833_v40, %v1418_v63 }
 0x266   : > { %1427 = vst [vmem:[#allocation1 + $0x1] ss:$2 sm:$0xff] %v1424_v46 }
 0x26d   : > { %v1428_v28 = vld.sshfl [vmem:[#allocation1] sm:$0xff pattern:$0x75316420]  ;;  %v1429_v51 = vld.sshfl [vmem:[#allocation1 + $0x8] sm:$0xff pattern:$0x75316420] }
 0x26e   : > { %v1432_v6 = vsel %vm444_vm1, %v3172_v35, %v1428_v28  ;;  %v1433_v25 = vsel %vm444_vm1, %v3173_v11, %v1429_v51 }
 0x26f   : > { %v1434_v42 = vpack.c.bf16 %v1432_v6, %v1432_v6  ;;  %v1435_v49 = vpack.c.bf16 %v1433_v25, %v1433_v25 }
 0x271   : > { %v1442_v29 = vsel %vm444_vm1, %v1434_v42, 0  ;;  %v1445_v32 = vsel %vm444_vm1, %v1435_v49, 0 }
 0x272   : > { %1454 = vmatpush.bf16.msra.mxu2 %v1442_v29  ;;  %1467 = vmatpush.bf16.msra.mxu3 %v1445_v32 }
 0x275   : > { %1622 = vmatmul.msk.bf16.vlgmr.msra.gmra.mxu2 %vm1437_vm9, %v1436_v13  ;;  %1623 = vmatmul.msk.bf16.vlgmr.msra.gmra.mxu3 %vm1437_vm9, %v1436_v13 }
 0x2f8   : > { %v1456_v34 = vpop.f32.mrf.mxu2  ;;  %v1469_v56 = vpop.f32.mrf.mxu3 }
 0x2f9   : > { %v1473_v0 = vmax.f32 %v1456_v34, 0.0  ;;  %v1474_v23 = vmax.f32 %v1469_v56, 0.0 }
 0x2fb   : > { %v1475_v16 = vpack.c.bf16 %v1474_v23, %v1473_v0 }
 0x2fd   : > { %1476 = vst [vmem:[%s371_s25] sm:$0xff] %v1475_v16 }
 0x2fe   : > { %2011 = shalt.err (!%p2008_p8)
}
 0x2ff   : > { %1651 = dma.vmem_to_hbm [thread:$0]  (%p2222_p5), %s1492_s1, 128, %s1494_s3, %s1478_s6  }
 0x300   : > { %v1458_v54 = vpop.f32.mrf.mxu2  ;;  %v1471_v38 = vpop.f32.mrf.mxu3 }
 0x301 PF: > { %p1683_p9 = scmp.ge.s32.totalorder %s2058_s30, 2  ;;  %s1505_s23 = sand.u32 1, %s2046_s27  }
 0x302   : > { %s1506_s10 = scalar_lea.sflag [#allocation5], %s1505_s23 }
 0x303   : > { %p1670_p10 = pnand %p1683_p9, %p2226_p6 }
 0x305   : > { %p1671_p11 = pneg %p1670_p10 }
 0x307   : > { %2041 = dma.done.wait (%p1671_p11), %s1506_s10, 128  }
 0x308   : > { %2043 = vsyncadd (%p1671_p11), %s1506_s10, 4294967168  ;;  %p21_p5 = scmp.ge.s32.totalorder %s2209_s11, 4   ;;  %s3174_s27 = smov %s2050_s28 }
 0x309   : > { %s3175_s28 = smov %s2054_s29  ;;  %s3176_s29 = smov %s2220_s14 }
 0x30a   : > { %s3177_s30 = smov %s2209_s11  ;;  %23 = sbr.rel (!%p21_p5) target bundleno = 10 (0xa), region = 117 }
 0x30f   :  { %1512 = vsyncpa [#allocation4], 1 }
 0x310   :  { %1514 = vsyncpa [#allocation4 + $0x1], 1 }
 0x311   :  { %1515 = vsyncpa [#allocation7], 1 }
 0x312   :  { %1516 = vsyncpa [#allocation10], 1 }
 0x313   :  { %1517 = vsyncpa [#allocation5], 1 }
 0x314   :  { %1519 = vsyncpa [#allocation5 + $0x1], 1 }

</bundles_post_ra>
